<compile_context>
chip_gen: v7x
topology: tpu7x:2x2x1
jax: 0.10.0
libtpu: 0.0.40
codegen_flags: <defaults>
</compile_context>

<pallas_src>
import functools
import math

import numpy as np

import jax
import jax.numpy as jnp
from jax.experimental import pallas as pl
from jax.experimental.pallas import tpu as pltpu

_EPS = 1e-8           # torch.nn.functional.cosine_similarity default eps
_EPS2 = _EPS * _EPS   # max(sqrt(x), eps) == sqrt(max(x, eps^2)) for x >= 0
_LANES = 128


def _round_up(x, m):
    return ((x + m - 1) // m) * m


# ---------------------------------------------------------------------------
# Path A: lane-packed fast path (C divides 128 and N divides by pack = 128//C).
# ---------------------------------------------------------------------------
def _cosine_kernel_packed(c1_ref, c2_ref, sel_ref, xi_ref, xj_ref, e_ref,
                          o_ref, *, pack):
    """Row tile of fused cosine similarity on lane-packed inputs.

    c1_ref, c2_ref : (1, 128)    coefficients tiled `pack` times along lanes
    sel_ref        : (128, 128)  0/1 lane-group selector (column g sums group g)
    xi/xj/e_ref    : (R, 128)    `pack` logical rows per vreg row
    o_ref          : (R, pack)   w for logical row (R_idx*pack + g) in column g
    """
    c1 = c1_ref[...].astype(jnp.float32)
    c2 = c2_ref[...].astype(jnp.float32)
    sel = sel_ref[...]
    xi = xi_ref[...].astype(jnp.float32)
    xj = xj_ref[...].astype(jnp.float32)
    e = e_ref[...].astype(jnp.float32)

    a1 = xj * c1                      # first half of coffs*q   (q = [x_j | e_ij])
    a2 = e * c2                       # second half
    p_dot = (a1 + a2) * xi            # k = [x_i | x_i] folds into one product
    p_qq = a1 * a1 + a2 * a2          # ||coffs*q||^2 integrand
    p_kk = xi * xi                    # 0.5 * ||k||^2 integrand

    def seg_sum(p):
        # Segmented lane-sum on the MXU: (R,128)@(128,128); column g of the
        # result is the sum over lane group g.  HIGHEST keeps full f32 accuracy.
        r = jnp.dot(p, sel, preferred_element_type=jnp.float32,
                    precision=jax.lax.Precision.HIGHEST)
        return r[:, :pack]

    dot = seg_sum(p_dot)
    qq = seg_sum(p_qq)
    kk = 2.0 * seg_sum(p_kk)

    denom = jnp.maximum(qq, _EPS2) * jnp.maximum(kk, _EPS2)
    o_ref[...] = (dot * jax.lax.rsqrt(denom)).astype(o_ref.dtype)


def _cosine_packed(c1, c2, x_i, x_j, e_ij, block_rows):
    N, C = x_i.shape
    pack = _LANES // C
    M = N // pack

    # Contiguous reshape: logical row n lives at packed row n//pack,
    # lane group n%pack.  No HBM data movement.
    xi_p = x_i.reshape(M, _LANES)
    xj_p = x_j.reshape(M, _LANES)
    e_p = e_ij.reshape(M, _LANES)
    c1_p = jnp.tile(c1, (1, pack))
    c2_p = jnp.tile(c2, (1, pack))

    sel_np = np.zeros((_LANES, _LANES), np.float32)
    for g in range(pack):
        sel_np[g * C:(g + 1) * C, g] = 1.0
    sel = jnp.asarray(sel_np)

    # Packed rows per grid step: multiple of 8, capped by VMEM (~2 MiB/operand
    # block) and by the (padded) total row count.
    rows = max(8, min(_round_up(max(block_rows // pack, 1), 8),
                      _round_up(M, 8), 4096))
    nb = pl.cdiv(M, rows)

    out = pl.pallas_call(
        functools.partial(_cosine_kernel_packed, pack=pack),
        out_shape=jax.ShapeDtypeStruct((nb * rows, pack), jnp.float32),
        grid=(nb,),
        in_specs=[
            pl.BlockSpec((1, _LANES), lambda i: (0, 0)),        # c1 (broadcast)
            pl.BlockSpec((1, _LANES), lambda i: (0, 0)),        # c2 (broadcast)
            pl.BlockSpec((_LANES, _LANES), lambda i: (0, 0)),   # selector
            pl.BlockSpec((rows, _LANES), lambda i: (i, 0)),     # x_i tile
            pl.BlockSpec((rows, _LANES), lambda i: (i, 0)),     # x_j tile
            pl.BlockSpec((rows, _LANES), lambda i: (i, 0)),     # e_ij tile
        ],
        out_specs=pl.BlockSpec((rows, pack), lambda i: (i, 0)),
        compiler_params=pltpu.CompilerParams(
            # Independent row tiles: lets v7x shard the grid across both TCs.
            dimension_semantics=("parallel",)),
    )(c1_p, c2_p, sel, xi_p, xj_p, e_p)

    return out[:M].reshape(N, 1)


# ---------------------------------------------------------------------------
# Path B: generic row-major path (any C, any N).
# ---------------------------------------------------------------------------
def _cosine_kernel_rowmajor(c1_ref, c2_ref, xi_ref, xj_ref, e_ref, o_ref):
    c1 = c1_ref[...].astype(jnp.float32)
    c2 = c2_ref[...].astype(jnp.float32)
    xi = xi_ref[...].astype(jnp.float32)
    xj = xj_ref[...].astype(jnp.float32)
    e = e_ref[...].astype(jnp.float32)

    a1 = xj * c1
    a2 = e * c2
    dot = jnp.sum((a1 + a2) * xi, axis=-1, keepdims=True)
    qq = jnp.sum(a1 * a1 + a2 * a2, axis=-1, keepdims=True)
    kk = 2.0 * jnp.sum(xi * xi, axis=-1, keepdims=True)

    denom = jnp.maximum(qq, _EPS2) * jnp.maximum(kk, _EPS2)
    o_ref[...] = (dot * jax.lax.rsqrt(denom)).astype(o_ref.dtype)


def _cosine_rowmajor(c1, c2, x_i, x_j, e_ij, block_rows):
    N, C = x_i.shape
    max_rows_by_vmem = max(8, ((2 * 1024 * 1024) // max(C * 4, 1)) // 8 * 8)
    br = max(8, min(_round_up(block_rows, 8), _round_up(N, 8), max_rows_by_vmem))
    nb = pl.cdiv(N, br)

    out = pl.pallas_call(
        _cosine_kernel_rowmajor,
        out_shape=jax.ShapeDtypeStruct((nb * br, 1), jnp.float32),
        grid=(nb,),
        in_specs=[
            pl.BlockSpec((1, C), lambda i: (0, 0)),      # c1 (broadcast)
            pl.BlockSpec((1, C), lambda i: (0, 0)),      # c2 (broadcast)
            pl.BlockSpec((br, C), lambda i: (i, 0)),     # x_i tile
            pl.BlockSpec((br, C), lambda i: (i, 0)),     # x_j tile
            pl.BlockSpec((br, C), lambda i: (i, 0)),     # e_ij tile
        ],
        out_specs=pl.BlockSpec((br, 1), lambda i: (i, 0)),
        compiler_params=pltpu.CompilerParams(dimension_semantics=("parallel",)),
    )(c1, c2, x_i, x_j, e_ij)

    return out[:N]


# ---------------------------------------------------------------------------
# Public wrapper / module.
# ---------------------------------------------------------------------------
def cosine_similarity_pallas(coffs, x_i, x_j, e_ij, *, block_rows=2048,
                             force_rowmajor=False):
    """Fused cosine_similarity(coffs * [x_j|e_ij], [x_i|x_i]) -> (N, 1) float32.

    coffs: (1, 2*C); x_i, x_j, e_ij: (N, C).  Any float dtype (upcast to f32).
    """
    N, C = x_i.shape
    assert x_j.shape == (N, C) and e_ij.shape == (N, C)
    assert coffs.shape == (1, 2 * C)
    c1 = coffs[:, :C]
    c2 = coffs[:, C:]

    packable = (not force_rowmajor and N > 0 and 1 <= C <= _LANES // 2
                and _LANES % C == 0 and N % (_LANES // C) == 0)
    if packable:
        return _cosine_packed(c1, c2, x_i, x_j, e_ij, block_rows)
    return _cosine_rowmajor(c1, c2, x_i, x_j, e_ij, block_rows)


class CosineSimilarityModule:
    """JAX/Pallas mirror of mp/weight_mp.py::Cosine_Similarity (forward only).

    agg_q / agg_k are fixed to channel concatenation (the only aggregator
    consistent with the in_size * dim_coff coefficient count, dim_coff == 2);
    the concatenation itself is fused into the kernel and never materialized.
    """

    def __init__(self, in_size, dim_coff, key):
        assert dim_coff == 2, "fused kernel implements the 2-tuple concat aggregators"
        channels = in_size * dim_coff
        # dot_product.coffs: (1, channels), glorot-uniform init.
        limit = math.sqrt(6.0 / (1 + channels))
        self.coffs = jax.random.uniform(
            key, (1, channels), dtype=jnp.float32, minval=-limit, maxval=limit)

    def __call__(self, x_i, x_j, e_ij):
        # q = concat([x_j, e_ij], -1); k = concat([x_i, x_i], -1)  (fused in-kernel)
        return cosine_similarity_pallas(self.coffs, x_i, x_j, e_ij)


def _reference(coffs, x_i, x_j, e_ij):
    q = jnp.concatenate([x_j, e_ij], axis=-1)
    k = jnp.concatenate([x_i, x_i], axis=-1)
    a = coffs * q
    dot = jnp.sum(a * k, axis=-1)
    na = jnp.maximum(jnp.linalg.norm(a, axis=-1), _EPS)
    nb = jnp.maximum(jnp.linalg.norm(k, axis=-1), _EPS)
    return (dot / (na * nb)).reshape(-1, 1)


if __name__ == "__main__":
    key = jax.random.PRNGKey(0)
    k_param, k_data = jax.random.split(key)

    in_size, dim_coff = 32, 2
    module = CosineSimilarityModule(in_size, dim_coff, k_param)

    cases = [
        # (N, block_rows, force_rowmajor)
        (256, None, False),   # packed fast path, single tile (module call)
        (360, 256, False),    # packed fast path, multi-block grid + ragged tail
        (203, 64, True),      # generic row-major path, ragged tail
    ]
    for idx, (N, br, force_rm) in enumerate(cases):
        ks = jax.random.split(jax.random.fold_in(k_data, idx), 3)
        x_i = jax.random.normal(ks[0], (N, in_size), dtype=jnp.float32)
        x_j = jax.random.normal(ks[1], (N, in_size), dtype=jnp.float32)
        e_ij = jax.random.normal(ks[2], (N, in_size), dtype=jnp.float32)

        if br is None:
            w = module(x_i, x_j, e_ij)
        else:
            w = cosine_similarity_pallas(module.coffs, x_i, x_j, e_ij,
                                         block_rows=br, force_rowmajor=force_rm)
        jax.block_until_ready(w)

        ref = _reference(module.coffs, x_i, x_j, e_ij)
        assert w.shape == (N, 1), (idx, w.shape)
        max_err = float(jnp.max(jnp.abs(w - ref)))
        assert max_err < 1e-4, f"case {idx}: max abs err {max_err}"

    print("KERNEL_OK")
</pallas_src>

<mosaic_0001>
module attributes {stable_mosaic.version = 11 : i64} {
  func.func @_cosine_kernel_packed(%arg0: i32, %arg1: memref<1x128xf32, #tpu.memory_space<vmem>>, %arg2: memref<1x128xf32, #tpu.memory_space<vmem>>, %arg3: memref<128x128xf32, #tpu.memory_space<vmem>>, %arg4: memref<64x128xf32, #tpu.memory_space<vmem>>, %arg5: memref<64x128xf32, #tpu.memory_space<vmem>>, %arg6: memref<64x128xf32, #tpu.memory_space<vmem>>, %arg7: memref<64x4xf32, #tpu.memory_space<vmem>>) attributes {dimension_semantics = [#tpu.dimension_semantics<parallel>], iteration_bounds = array<i64: 1>, scalar_prefetch = 0 : i64, scratch_operands = 0 : i64, tpu.core_type = #tpu.core_type<tc>, window_params = [{pipeline_mode = #tpu.pipeline_mode<synchronous>, transform_indices = @transform_0, window_bounds = array<i64: 1, 128>}, {pipeline_mode = #tpu.pipeline_mode<synchronous>, transform_indices = @transform_1, window_bounds = array<i64: 1, 128>}, {pipeline_mode = #tpu.pipeline_mode<synchronous>, transform_indices = @transform_2, window_bounds = array<i64: 128, 128>}, {transform_indices = @transform_3, window_bounds = array<i64: 64, 128>}, {transform_indices = @transform_4, window_bounds = array<i64: 64, 128>}, {transform_indices = @transform_5, window_bounds = array<i64: 64, 128>}, {transform_indices = @transform_6, window_bounds = array<i64: 64, 4>}]} {
    %c0 = arith.constant 0 : index
    %c0_0 = arith.constant 0 : index
    %0 = vector.load %arg1[%c0, %c0_0] : memref<1x128xf32, #tpu.memory_space<vmem>>, vector<1x128xf32>
    %c0_1 = arith.constant 0 : index
    %c0_2 = arith.constant 0 : index
    %1 = vector.load %arg2[%c0_1, %c0_2] : memref<1x128xf32, #tpu.memory_space<vmem>>, vector<1x128xf32>
    %c0_3 = arith.constant 0 : index
    %c0_4 = arith.constant 0 : index
    %2 = vector.load %arg3[%c0_3, %c0_4] : memref<128x128xf32, #tpu.memory_space<vmem>>, vector<128x128xf32>
    %c0_5 = arith.constant 0 : index
    %c0_6 = arith.constant 0 : index
    %3 = vector.load %arg4[%c0_5, %c0_6] : memref<64x128xf32, #tpu.memory_space<vmem>>, vector<64x128xf32>
    %c0_7 = arith.constant 0 : index
    %c0_8 = arith.constant 0 : index
    %4 = vector.load %arg5[%c0_7, %c0_8] : memref<64x128xf32, #tpu.memory_space<vmem>>, vector<64x128xf32>
    %c0_9 = arith.constant 0 : index
    %c0_10 = arith.constant 0 : index
    %5 = vector.load %arg6[%c0_9, %c0_10] : memref<64x128xf32, #tpu.memory_space<vmem>>, vector<64x128xf32>
    %6 = vector.broadcast %0 : vector<1x128xf32> to vector<64x128xf32>
    %7 = arith.mulf %4, %6 : vector<64x128xf32>
    %8 = vector.broadcast %1 : vector<1x128xf32> to vector<64x128xf32>
    %9 = arith.mulf %5, %8 : vector<64x128xf32>
    %10 = arith.addf %7, %9 : vector<64x128xf32>
    %11 = arith.mulf %10, %3 : vector<64x128xf32>
    %12 = arith.mulf %7, %7 : vector<64x128xf32>
    %13 = arith.mulf %9, %9 : vector<64x128xf32>
    %14 = arith.addf %12, %13 : vector<64x128xf32>
    %15 = arith.mulf %3, %3 : vector<64x128xf32>
    %cst = arith.constant dense<0.000000e+00> : vector<64x128xf32>
    %16 = tpu.matmul %11, %2, %cst {dimension_numbers = #tpu.dot_dimension_numbers<[1], [0], [0], [1], [0, 0, 1, 1], [], []>, precision = #tpu.contract_precision<fp32>} : vector<64x128xf32>, vector<128x128xf32>, vector<64x128xf32> -> vector<64x128xf32>
    %17 = vector.extract_strided_slice %16 {offsets = [0, 0], sizes = [64, 4], strides = [1, 1]} : vector<64x128xf32> to vector<64x4xf32>
    %cst_11 = arith.constant dense<0.000000e+00> : vector<64x128xf32>
    %18 = tpu.matmul %14, %2, %cst_11 {dimension_numbers = #tpu.dot_dimension_numbers<[1], [0], [0], [1], [0, 0, 1, 1], [], []>, precision = #tpu.contract_precision<fp32>} : vector<64x128xf32>, vector<128x128xf32>, vector<64x128xf32> -> vector<64x128xf32>
    %19 = vector.extract_strided_slice %18 {offsets = [0, 0], sizes = [64, 4], strides = [1, 1]} : vector<64x128xf32> to vector<64x4xf32>
    %cst_12 = arith.constant dense<0.000000e+00> : vector<64x128xf32>
    %20 = tpu.matmul %15, %2, %cst_12 {dimension_numbers = #tpu.dot_dimension_numbers<[1], [0], [0], [1], [0, 0, 1, 1], [], []>, precision = #tpu.contract_precision<fp32>} : vector<64x128xf32>, vector<128x128xf32>, vector<64x128xf32> -> vector<64x128xf32>
    %21 = vector.extract_strided_slice %20 {offsets = [0, 0], sizes = [64, 4], strides = [1, 1]} : vector<64x128xf32> to vector<64x4xf32>
    %cst_13 = arith.constant 2.000000e+00 : f32
    %22 = vector.broadcast %cst_13 : f32 to vector<64x4xf32>
    %23 = arith.mulf %22, %21 : vector<64x4xf32>
    %cst_14 = arith.constant 1.000000e-16 : f32
    %24 = vector.broadcast %cst_14 : f32 to vector<64x4xf32>
    %25 = arith.maximumf %19, %24 : vector<64x4xf32>
    %cst_15 = arith.constant 1.000000e-16 : f32
    %26 = vector.broadcast %cst_15 : f32 to vector<64x4xf32>
    %27 = arith.maximumf %23, %26 : vector<64x4xf32>
    %28 = arith.mulf %25, %27 : vector<64x4xf32>
    %29 = math.rsqrt %28 : vector<64x4xf32>
    %30 = arith.mulf %17, %29 : vector<64x4xf32>
    %c0_16 = arith.constant 0 : index
    %c0_17 = arith.constant 0 : index
    %31 = vector.load %arg7[%c0_16, %c0_17] : memref<64x4xf32, #tpu.memory_space<vmem>>, vector<64x4xf32>
    tpu.vector_store %arg7[%c0_16, %c0_17], %30 {strides = array<i32>} : memref<64x4xf32, #tpu.memory_space<vmem>>, vector<64x4xf32>,
    return
  }
  func.func @transform_0(%arg0: i32) -> (i32, i32) {
    %c0_i32 = arith.constant 0 : i32
    %c0_i32_0 = arith.constant 0 : i32
    %c0_i32_1 = arith.constant 0 : i32
    return %c0_i32, %c0_i32_0 : i32, i32
  }
  func.func @transform_1(%arg0: i32) -> (i32, i32) {
    %c0_i32 = arith.constant 0 : i32
    %c0_i32_0 = arith.constant 0 : i32
    %c0_i32_1 = arith.constant 0 : i32
    return %c0_i32, %c0_i32_0 : i32, i32
  }
  func.func @transform_2(%arg0: i32) -> (i32, i32) {
    %c0_i32 = arith.constant 0 : i32
    %c0_i32_0 = arith.constant 0 : i32
    %c0_i32_1 = arith.constant 0 : i32
    return %c0_i32, %c0_i32_0 : i32, i32
  }
  func.func @transform_3(%arg0: i32) -> (i32, i32) {
    %c0_i32 = arith.constant 0 : i32
    %c0_i32_0 = arith.constant 0 : i32
    return %arg0, %c0_i32 : i32, i32
  }
  func.func @transform_4(%arg0: i32) -> (i32, i32) {
    %c0_i32 = arith.constant 0 : i32
    %c0_i32_0 = arith.constant 0 : i32
    return %arg0, %c0_i32 : i32, i32
  }
  func.func @transform_5(%arg0: i32) -> (i32, i32) {
    %c0_i32 = arith.constant 0 : i32
    %c0_i32_0 = arith.constant 0 : i32
    return %arg0, %c0_i32 : i32, i32
  }
  func.func @transform_6(%arg0: i32) -> (i32, i32) {
    %c0_i32 = arith.constant 0 : i32
    %c0_i32_0 = arith.constant 0 : i32
    return %arg0, %c0_i32 : i32, i32
  }
}

</mosaic_0001>

<bundles_post_ra>
// kernel: tpu_custom_call.1
= control target key start
LH: loop header
LB: loop body
LE: loop exit
PB: predicated region body
PF: predicated region fallthrough
CT: control target
= control target key end

     0   :  { %11 = vsyncpa [#allocation3], 0  ;;  %s6386_s0 = inlined_call_operand.hbm [shape: f32[1,128], index: 0, kind: input, shape index: {}]   ;;  %s6387_s1 = inlined_call_operand.vmem [shape: f32[1,128], index: 1, kind: input, shape index: {}]   ;;  %s6388_s2 = inlined_call_operand.hbm [shape: f32[128,128], index: 2, kind: input, shape index: {}]   ;;  %s6389_s3 = inlined_call_operand.hbm [shape: f32[64,128], index: 3, kind: input, shape index: {}]   ;;  %s6390_s4 = inlined_call_operand.hbm [shape: f32[64,128], index: 4, kind: input, shape index: {}]   ;;  %s6391_s5 = inlined_call_operand.hbm [shape: f32[64,128], index: 5, kind: input, shape index: {}]   ;;  %s6392_s6 = inlined_call_operand.vmem [shape: f32[64,4], index: 6, kind: output, shape index: {}]  }
   0x1   :  { %12 = vsyncpa [#allocation5], 0 }
   0x2   :  { %13 = vsyncpa [#allocation8], 0  ;;  %s5158_s21 = smov [#allocation4]   ;;  %s5042_s25 = scalar_lea.hbm %s6388_s2, 2048 }
   0x3   :  { %s31_s22 = sshll.u32 %s5158_s21, 4  ;;  %p5043_p0 = scmp.ne.s32.totalorder %s6388_s2, %s5042_s25  ;;  %s32_s22 = int_to_ptr.vmem [resolvable:$true] %s31_s22 }
   0x4   :  { %p5046_p1 = scmp.lt.u32.totalorder %s5042_s25, %s6388_s2 }
   0x6   :  { %p5048_p2 = pnand %p5046_p1, %p5043_p0 }
   0x8   :  { %5051 = shalt.err (!%p5048_p2)
}
   0x9   :  { %s5052_s30 = scalar_lea.vmem %s32_s22, 2048  ;;  %p5057_p4 = scmp.lt.s32.totalorder %s32_s22, %s32_s22 }
   0xa   :  { %p5053_p3 = scmp.ne.s32.totalorder %s32_s22, %s5052_s30  ;;  %p5058_p5 = scmp.lt.s32.totalorder %s5052_s30, %s5052_s30 }
   0xc   :  { %p5059_p6 = por %p5058_p5, %p5057_p4 }
   0xe   :  { %p5060_p7 = pnand %p5059_p6, %p5053_p3 }
  0x10   :  { %5063 = shalt.err (!%p5060_p7)
}
  0x11   :  { %s5159_s7 = smov 128   ;;  %s5160_s8 = smov 8  }
  0x12   :  { %37 = dma.hbm_to_vmem [thread:$0]  %s6388_s2, 2048, %s32_s22, [#allocation5], %s5159_s7, %s5159_s7, %s5160_s8  }
  0x13   :  { %s5161_s11 = smov [#allocation7]   ;;  %s5162_s13 = smov [#allocation2]  }
  0x14   :  { %s55_s12 = sshll.u32 %s5161_s11, 4  ;;  %s20_s14 = sshll.u32 %s5162_s13, 4  ;;  %s56_s12 = int_to_ptr.vmem [resolvable:$true] %s55_s12  ;;  %s21_s14 = int_to_ptr.vmem [resolvable:$true] %s20_s14 }
  0x15   :  { %s5064_s17 = scalar_lea.hbm %s6390_s4, 1024 }
  0x16   :  { %p5065_p8 = scmp.ne.s32.totalorder %s6390_s4, %s5064_s17  ;;  %p5068_p9 = scmp.lt.u32.totalorder %s5064_s17, %s6390_s4 }
  0x18   :  { %p5070_p10 = pnand %p5068_p9, %p5065_p8 }
  0x1a   :  { %5073 = shalt.err (!%p5070_p10)
}
  0x1b   :  { %s5074_s2 = scalar_lea.vmem %s56_s12, 1024  ;;  %p5079_p12 = scmp.lt.s32.totalorder %s56_s12, %s56_s12 }
  0x1c   :  { %p5075_p11 = scmp.ne.s32.totalorder %s56_s12, %s5074_s2  ;;  %p5080_p13 = scmp.lt.s32.totalorder %s5074_s2, %s5074_s2 }
  0x1e   :  { %p5081_p0 = por %p5080_p13, %p5079_p12 }
  0x20   :  { %p5082_p1 = pnand %p5081_p0, %p5075_p11 }
  0x22   :  { %5085 = shalt.err (!%p5082_p1)
}
  0x23   :  { %61 = dma.hbm_to_vmem [thread:$0]  %s6390_s4, 1024, %s56_s12, [#allocation8], %s5159_s7, %s5159_s7, %s5160_s8  }
  0x24   :  { %s5086_s26 = scalar_lea.hbm %s6386_s0, 16 }
  0x25   :  { %p5087_p2 = scmp.ne.s32.totalorder %s6386_s0, %s5086_s26  ;;  %p5090_p3 = scmp.lt.u32.totalorder %s5086_s26, %s6386_s0 }
  0x27   :  { %p5092_p4 = pnand %p5090_p3, %p5087_p2 }
  0x29   :  { %5095 = shalt.err (!%p5092_p4)
}
  0x2a   :  { %s5096_s9 = scalar_lea.vmem %s21_s14, 16  ;;  %s5100_s10 = scalar_lea.vmem %s21_s14, 32 }
  0x2b   :  { %p5097_p5 = scmp.ne.s32.totalorder %s21_s14, %s5096_s9  ;;  %p5101_p6 = scmp.lt.s32.totalorder %s21_s14, %s21_s14 }
  0x2c   :  { %p5102_p7 = scmp.lt.s32.totalorder %s5100_s10, %s5096_s9 }
  0x2e   :  { %p5103_p8 = por %p5102_p7, %p5101_p6 }
  0x30   :  { %p5104_p9 = pnand %p5103_p8, %p5097_p5 }
  0x32   :  { %5107 = shalt.err (!%p5104_p9)
}
  0x33   :  { %23 = dma.hbm_to_vmem [thread:$0]  %s6386_s0, 16, %s21_s14, [#allocation3]  }
  0x34   :  { %s5163_s12 = smov [#allocation6]   ;;  %s5164_s15 = smov [#allocation9]  }
  0x35   :  { %s43_s13 = sshll.u32 %s5163_s12, 4  ;;  %s67_s16 = sshll.u32 %s5164_s15, 4  ;;  %s44_s13 = int_to_ptr.vmem [resolvable:$true] %s43_s13  ;;  %s68_s16 = int_to_ptr.vmem [resolvable:$true] %s67_s16 }
  0x36   :  { %s5108_s19 = scalar_lea.hbm %s6389_s3, 1024 }
  0x37   :  { %p5109_p10 = scmp.ne.s32.totalorder %s6389_s3, %s5108_s19  ;;  %p5112_p11 = scmp.lt.u32.totalorder %s5108_s19, %s6389_s3 }
  0x39   :  { %p5114_p12 = pnand %p5112_p11, %p5109_p10 }
  0x3b   :  { %5117 = shalt.err (!%p5114_p12)
}
  0x3c   :  { %s5118_s0 = scalar_lea.vmem %s44_s13, 1024  ;;  %p5123_p0 = scmp.lt.s32.totalorder %s44_s13, %s44_s13 }
  0x3d   :  { %p5119_p13 = scmp.ne.s32.totalorder %s44_s13, %s5118_s0  ;;  %p5124_p1 = scmp.lt.s32.totalorder %s5118_s0, %s5118_s0 }
  0x3f   :  { %p5125_p2 = por %p5124_p1, %p5123_p0 }
  0x41   :  { %p5126_p3 = pnand %p5125_p2, %p5119_p13 }
  0x43   :  { %5129 = shalt.err (!%p5126_p3)
}
  0x44   :  { %49 = dma.hbm_to_vmem [thread:$0]  %s6389_s3, 1024, %s44_s13, [#allocation5], %s5159_s7, %s5159_s7, %s5160_s8  }
  0x45   :  { %s5130_s26 = scalar_lea.hbm %s6391_s5, 1024 }
  0x46   :  { %p5131_p4 = scmp.ne.s32.totalorder %s6391_s5, %s5130_s26  ;;  %p5134_p5 = scmp.lt.u32.totalorder %s5130_s26, %s6391_s5 }
  0x48   :  { %p5136_p6 = pnand %p5134_p5, %p5131_p4 }
  0x4a   :  { %5139 = shalt.err (!%p5136_p6)
}
  0x4b   :  { %s5140_s9 = scalar_lea.vmem %s68_s16, 1024  ;;  %p5145_p8 = scmp.lt.s32.totalorder %s68_s16, %s68_s16 }
  0x4c   :  { %p5141_p7 = scmp.ne.s32.totalorder %s68_s16, %s5140_s9  ;;  %p5146_p9 = scmp.lt.s32.totalorder %s5140_s9, %s5140_s9 }
  0x4e   :  { %p5147_p10 = por %p5146_p9, %p5145_p8 }
  0x50   :  { %p5148_p11 = pnand %p5147_p10, %p5141_p7 }
  0x52   :  { %5151 = shalt.err (!%p5148_p11)
}
  0x53   :  { %73 = dma.hbm_to_vmem [thread:$0]  %s6391_s5, 1024, %s68_s16, [#allocation8], %s5159_s7, %s5159_s7, %s5160_s8  }
  0x54   :  { %5152 = dma.done.wait [#allocation3], 16  }
  0x55   :  { %5153 = vsyncadd [#allocation3], 4294967280 }
  0x56   :  { %5154 = dma.done.wait [#allocation5], 3072  }
  0x57   :  { %5155 = vsyncadd [#allocation5], 4294964224 }
  0x58   :  { %5156 = dma.done.wait [#allocation8], 2048  }
  0x59   :  { %5157 = vsyncadd [#allocation8], 4294965248  ;;  %v91_v0 = vld [vmem:[#allocation4] sm:$0xff]  ;;  %v92_v1 = vld [vmem:[#allocation4 + $0x8] sm:$0xff]  ;;  %vm3081_vm0 = vcmask 31744  }
  0x5a   :  { %v93_v2 = vld [vmem:[#allocation4 + $0x10] sm:$0xff]  ;;  %v208_v3 = vand.u32 4294901760, %v91_v0  ;;  %v211_v4 = vand.u32 4294901760, %v92_v1  ;;  %v94_v5 = vld [vmem:[#allocation4 + $0x18] sm:$0xff]  ;;  %v5272_v7 = vld [vmem:[#allocation4 + $0x20] sm:$0xff] }
  0x5b   :  { %v214_v6 = vand.u32 4294901760, %v93_v2  ;;  %v5274_v8 = vld [vmem:[#allocation4 + $0x28] sm:$0xff]  ;;  %v217_v9 = vand.u32 4294901760, %v94_v5  ;;  %v220_v11 = vand.u32 4294901760, %v5272_v7  ;;  %v5282_v14 = vld [vmem:[#allocation4 + $0x30] sm:$0xff]  ;;  %v5284_v15 = vld [vmem:[#allocation4 + $0x38] sm:$0xff] }
  0x5c   :  { %v5276_v10 = vpack.c.bf16 %v211_v4, %v208_v3  ;;  %v223_v12 = vand.u32 4294901760, %v5274_v8  ;;  %v5288_v16 = vld [vmem:[#allocation2] ss:$0 sm:$0xff]  ;;  %v5292_v17 = vld [vmem:[#allocation4 + $0x40] sm:$0xff]  ;;  %v226_v21 = vand.u32 4294901760, %v5282_v14  ;;  %v229_v22 = vand.u32 4294901760, %v5284_v15 }
  0x5d   :  { %v5280_v13 = vpack.c.bf16 %v217_v9, %v214_v6  ;;  %v5297_v18 = vld [vmem:[%s6387_s1] ss:$0 sm:$0xff]  ;;  %v115_v19 = vld [vmem:[#allocation7] sm:$0xff]  ;;  %v5305_v23 = vld [vmem:[#allocation4 + $0x48] sm:$0xff]  ;;  %v5313_v28 = vsub.f32 %v91_v0, %v208_v3  ;;  %v5317_v31 = vsub.f32 %v92_v1, %v211_v4  ;;  %v232_v34 = vand.u32 4294901760, %v5292_v17 }
  0x5e   :  { %4324 = vmatprep.subr.bf16.mxu1 %v5276_v10  ;;  %4420 = vmatprep.subr.bf16.mxu0 %v5276_v10  ;;  %v5301_v20 = vpack.c.bf16 %v223_v12, %v220_v11  ;;  %v123_v24 = vld [vmem:[#allocation9] sm:$0xff]  ;;  %v5308_v25 = vmul.f32 %v5288_v16, %v115_v19  ;;  %v116_v26 = vld [vmem:[#allocation7 + $0x8] sm:$0xff]  ;;  %v235_v35 = vand.u32 4294901760, %v5305_v23  ;;  %v5337_v38 = vpack.c.bf16 %v229_v22, %v226_v21  ;;  %v5339_v39 = vld [vmem:[#allocation4 + $0x50] sm:$0xff] }
  0x5f   :  { %4326 = vmatpush3.bf16.msra.mxu1 %v5276_v10  ;;  %4422 = vmatpush3.bf16.msra.mxu0 %v5276_v10  ;;  %v5311_v27 = vmul.f32 %v5297_v18, %v123_v24  ;;  %v124_v29 = vld [vmem:[#allocation9 + $0x8] sm:$0xff]  ;;  %v5315_v30 = vld [vmem:[#allocation6] sm:$0xff]  ;;  %v5320_v32 = vmul.f32 %v5288_v16, %v116_v26  ;;  %v5341_v40 = vld [vmem:[#allocation4 + $0x58] sm:$0xff]  ;;  %v5345_v42 = vsub.f32 %v93_v2, %v214_v6  ;;  %v371_v44 = vand.u32 4294901760, %v5313_v28 }
  0x60   :  { %4328 = vmatprep.subr.bf16.mxu1 %v5280_v13  ;;  %4424 = vmatprep.subr.bf16.mxu0 %v5280_v13  ;;  %6466 = vst [vmem:[#allocation13_spill] sm:$0xff] %v5301_v20  ;;  %6467 = vst [vmem:[#allocation14_spill] sm:$0xff] %v5315_v30  ;;  %v5323_v33 = vmul.f32 %v5297_v18, %v124_v29  ;;  %v5331_v37 = vld [vmem:[#allocation6 + $0x8] sm:$0xff]  ;;  %v378_v45 = vand.u32 4294901760, %v5317_v31  ;;  %v5351_v47 = vsub.f32 %v94_v5, %v217_v9  ;;  %v5363_v51 = vld [vmem:[#allocation4 + $0x60] sm:$0xff] }
  0x61   :  { %v159_v36 = vadd.f32 %v5311_v27, %v5308_v25  ;;  %6468 = vst [vmem:[#allocation15_spill] sm:$0xff] %v5331_v37  ;;  %6469 = vst [vmem:[#allocation16_spill] sm:$0xff] %v5337_v38  ;;  %v5359_v48 = vpack.c.bf16 %v235_v35, %v232_v34  ;;  %v6399_v49 = vand.u32 4294901760, %v5339_v39  ;;  %v6398_v50 = vand.u32 4294901760, %v5341_v40  ;;  %v5365_v52 = vld [vmem:[#allocation4 + $0x68] sm:$0xff]  ;;  %v5371_v54 = vld [vmem:[#allocation4 + $0x70] sm:$0xff] }
  0x62   :  { %v160_v41 = vadd.f32 %v5323_v33, %v5320_v32  ;;  %v5373_v55 = vld [vmem:[#allocation4 + $0x78] sm:$0xff]  ;;  %v385_v57 = vand.u32 4294901760, %v5345_v42  ;;  %v5379_v58 = vsub.f32 %v5272_v7, %v220_v11  ;;  %v5382_v59 = vsub.f32 %v5274_v8, %v223_v12 }
  0x63   :  { %4330 = vmatpush3.bf16.msra.mxu1 %v5280_v13  ;;  %4426 = vmatpush3.bf16.msra.mxu0 %v5280_v13  ;;  %v167_v43 = vmul.f32 %v159_v36, %v5315_v30  ;;  %6470 = vst [vmem:[#allocation17_spill] sm:$0xff] %v5359_v48  ;;  %v372_v61 = vsub.f32 %v5313_v28, %v371_v44  ;;  %v392_v63 = vand.u32 4294901760, %v5351_v47  ;;  %v6396_v0 = vand.u32 4294901760, %v5363_v51  ;;  %v117_v36 = vld [vmem:[#allocation7 + $0x10] sm:$0xff] }
  0x64   :  { %4332 = vmatprep.subr.bf16.mxu1 %v5301_v20  ;;  %4428 = vmatprep.subr.bf16.mxu0 %v5301_v20  ;;  %v168_v46 = vmul.f32 %v160_v41, %v5331_v37  ;;  %v379_v62 = vsub.f32 %v5317_v31, %v378_v45  ;;  %v6395_v1 = vand.u32 4294901760, %v5365_v52  ;;  %v6394_v3 = vand.u32 4294901760, %v5371_v54 }
  0x65   :  { %v5367_v53 = vand.u32 4294901760, %v167_v43  ;;  %v6393_v4 = vand.u32 4294901760, %v5373_v55  ;;  %v5401_v6 = vsub.f32 %v5282_v14, %v226_v21  ;;  %v5409_v7 = vpack.c.bf16 %v6398_v50, %v6399_v49 }
  0x66   :  { %v5375_v56 = vand.u32 4294901760, %v168_v46  ;;  %v386_v8 = vsub.f32 %v5345_v42, %v385_v57  ;;  %v399_v9 = vand.u32 4294901760, %v5379_v58  ;;  %v406_v11 = vand.u32 4294901760, %v5382_v59 }
  0x67   :  { %4334 = vmatpush3.bf16.msra.mxu1 %v5301_v20  ;;  %4430 = vmatpush3.bf16.msra.mxu0 %v5301_v20  ;;  %v5385_v60 = vsub.f32 %v167_v43, %v5367_v53  ;;  %6473 = vst [vmem:[#allocation20_spill] sm:$0xff] %v5401_v6  ;;  %6474 = vst [vmem:[#allocation21_spill] sm:$0xff] %v5409_v7  ;;  %v373_v14 = vand.u32 4294901760, %v372_v61  ;;  %v380_v19 = vand.u32 4294901760, %v379_v62  ;;  %v413_v61 = vand.u32 4294901760, %v5401_v6 }
  0x68   :  { %4336 = vmatprep.subr.bf16.mxu1 %v5337_v38  ;;  %4432 = vmatprep.subr.bf16.mxu0 %v5337_v38  ;;  %v5393_v2 = vsub.f32 %v168_v46, %v5375_v56  ;;  %v393_v21 = vsub.f32 %v5351_v47, %v392_v63  ;;  %v5420_v24 = vpack.c.bf16 %v6395_v1, %v6396_v0  ;;  %v387_v62 = vand.u32 4294901760, %v386_v8 }
  0x69   :  { %6471 = vst [vmem:[#allocation18_spill] sm:$0xff] %v5385_v60  ;;  %v290_v5 = vand.u32 4294901760, %v5385_v60  ;;  %v5426_v29 = vsub.f32 %v5284_v15, %v229_v22  ;;  %v5434_v41 = vpack.c.bf16 %v6393_v4, %v6394_v3  ;;  %v5438_v46 = vmul.f32 %v5320_v32, %v5320_v32  ;;  %v125_v15 = vld [vmem:[#allocation9 + $0x10] sm:$0xff]  ;;  %v118_v3 = vld [vmem:[#allocation7 + $0x18] sm:$0xff] }
  0x6a   :  { %6472 = vst [vmem:[#allocation19_spill] sm:$0xff] %v5393_v2  ;;  %6475 = vst [vmem:[#allocation22_spill] sm:$0xff] %v5420_v24  ;;  %v6397_v26 = vand.u32 4294901760, %v5393_v2  ;;  %v5443_v22 = vpack.c.bf16 %v378_v45, %v371_v44  ;;  %v407_v4 = vsub.f32 %v5382_v59, %v406_v11  ;;  %v394_v32 = vand.u32 4294901760, %v393_v21 }
  0x6b   :  { %4338 = vmatpush3.bf16.msra.mxu1 %v5337_v38  ;;  %4434 = vmatpush3.bf16.msra.mxu0 %v5337_v38  ;;  %v291_v12 = vsub.f32 %v5385_v60, %v290_v5  ;;  %6476 = vst [vmem:[#allocation23_spill] sm:$0xff] %v5426_v29  ;;  %6477 = vst [vmem:[#allocation24_spill] sm:$0xff] %v5434_v41  ;;  %v5449_v1 = vpack.c.bf16 %v392_v63, %v385_v57  ;;  %v420_v45 = vand.u32 4294901760, %v5426_v29  ;;  %v126_v57 = vld [vmem:[#allocation9 + $0x18] sm:$0xff]  ;;  %v119_v63 = vld [vmem:[#allocation7 + $0x20] sm:$0xff] }
  0x6c   :  { %4340 = vmatprep.subr.bf16.mxu1 %v5359_v48  ;;  %4436 = vmatprep.subr.bf16.mxu0 %v5359_v48  ;;  %6478 = vst [vmem:[#allocation25_spill] sm:$0xff] %v5443_v22  ;;  %v5452_v0 = vmul.f32 %v5288_v16, %v117_v36  ;;  %v5457_v44 = vsub.f32 %v5393_v2, %v6397_v26  ;;  %v6498_v20 = vand.u32 4294901760, %v5393_v2 }
  0x6d   :  { %3695 = vmatprep.mubr.f32.mxu0 %v290_v5  ;;  %v292_v43 = vand.u32 4294901760, %v291_v12  ;;  %v400_v5 = vsub.f32 %v5379_v58, %v399_v9  ;;  %v5447_v12 = vpack.c.bf16 %v380_v19, %v373_v14  ;;  %6480 = vst [vmem:[#allocation27_spill] sm:$0xff] %v5449_v1  ;;  %v5463_v8 = vsub.f32 %v5292_v17, %v232_v34  ;;  %v127_v19 = vld [vmem:[#allocation9 + $0x20] sm:$0xff]  ;;  %v5478_v17 = vld [vmem:[#allocation6 + $0x10] sm:$0xff] }
  0x6e   :  { %v5466_v14 = vmul.f32 %v5297_v18, %v125_v15  ;;  %v5471_v21 = vsub.f32 %v5401_v6, %v413_v61  ;;  %v5476_v36 = vsub.f32 %v5305_v23, %v235_v35  ;;  %6481 = vst [vmem:[#allocation28_spill] sm:$0xff] %v5478_v17  ;;  %v5481_v34 = vmul.f32 %v5288_v16, %v118_v3 }
  0x6f   :  { %4342 = vmatpush3.bf16.msra.mxu1 %v5359_v48  ;;  %4438 = vmatpush3.bf16.msra.mxu0 %v5359_v48  ;;  %6479 = vst [vmem:[#allocation26_spill] sm:$0xff] %v5447_v12  ;;  %v408_v15 = vand.u32 4294901760, %v407_v4  ;;  %v5485_v26 = vpack.c.bf16 %v406_v11, %v399_v9  ;;  %v5489_v49 = vpack.c.bf16 %v394_v32, %v387_v62  ;;  %v302_v37 = vand.u32 4294901760, %v5457_v44  ;;  %v5506_v62 = vld [vmem:[#allocation6 + $0x20] sm:$0xff]  ;;  %v120_v32 = vld [vmem:[#allocation7 + $0x28] sm:$0xff] }
  0x70   :  { %4344 = vmatprep.subr.bf16.mxu1 %v5409_v7  ;;  %4440 = vmatprep.subr.bf16.mxu0 %v5409_v7  ;;  %v161_v50 = vadd.f32 %v5466_v14, %v5452_v0  ;;  %v5492_v23 = vmul.f32 %v5297_v18, %v126_v57  ;;  %v5495_v35 = vmul.f32 %v5288_v16, %v119_v63  ;;  %v415_v57 = vand.u32 4294901760, %v5471_v21 }
  0x71   :  { %3563 = vmatprep.mubr.f32.mxu1 %v292_v43  ;;  %v401_v43 = vand.u32 4294901760, %v400_v5  ;;  %6482 = vst [vmem:[#allocation29_spill] sm:$0xff] %v5485_v26  ;;  %6483 = vst [vmem:[#allocation30_spill] sm:$0xff] %v5489_v49  ;;  %v5498_v3 = vmul.f32 %v5297_v18, %v127_v19  ;;  %v421_v4 = vsub.f32 %v5426_v29, %v420_v45  ;;  %v5504_v5 = vld [vmem:[#allocation6 + $0x18] sm:$0xff]  ;;  %v6488_v21 = vand.u32 4294901760, %v5339_v39 }
  0x72   :  { %v169_v11 = vmul.f32 %v161_v50, %v5478_v17  ;;  %6484 = vst [vmem:[#allocation31_spill] sm:$0xff] %v5504_v5  ;;  %6485 = vst [vmem:[#allocation32_spill] sm:$0xff] %v5506_v62  ;;  %v162_v44 = vadd.f32 %v5492_v23, %v5481_v34  ;;  %v128_v50 = vld [vmem:[#allocation9 + $0x28] sm:$0xff]  ;;  %v5520_v17 = vpack.c.bf16 %v420_v45, %v413_v61  ;;  %v129_v45 = vld [vmem:[#allocation9 + $0x30] sm:$0xff]  ;;  %v6490_v38 = vand.u32 4294901760, %v5463_v8 }
  0x73   :  { %4346 = vmatpush3.bf16.msra.mxu1 %v5409_v7  ;;  %4442 = vmatpush3.bf16.msra.mxu0 %v5409_v7  ;;  %v163_v19 = vadd.f32 %v5498_v3, %v5495_v35  ;;  %v5518_v9 = vpack.c.bf16 %v408_v15, %v401_v43  ;;  %v5527_v63 = vsub.f32 %v5339_v39, %v6488_v21  ;;  %v6489_v7 = vand.u32 4294901760, %v5341_v40 }
  0x74   :  { %4348 = vmatprep.subr.bf16.mxu1 %v5420_v24  ;;  %4444 = vmatprep.subr.bf16.mxu0 %v5420_v24  ;;  %6487 = vst [vmem:[#allocation34_spill] sm:$0xff] %v5520_v17  ;;  %v5522_v30 = vand.u32 4294901760, %v169_v11  ;;  %v170_v48 = vmul.f32 %v162_v44, %v5504_v5  ;;  %v5537_v61 = vmul.f32 %v5288_v16, %v120_v32  ;;  %v422_v15 = vand.u32 4294901760, %v421_v4 }
  0x75   :  { %6486 = vst [vmem:[#allocation33_spill] sm:$0xff] %v5518_v9  ;;  %v5532_v60 = vsub.f32 %v5341_v40, %v6489_v7  ;;  %v171_v43 = vmul.f32 %v163_v19, %v5506_v62  ;;  %v5542_v39 = vsub.f32 %v5463_v8, %v6490_v38  ;;  %v5548_v40 = vmul.f32 %v5297_v18, %v128_v50  ;;  %v5561_v38 = vld [vmem:[#allocation6 + $0x28] sm:$0xff]  ;;  %v5587_v50 = vld [vmem:[#allocation6 + $0x30] sm:$0xff] }
  0x76   :  { %v5545_v21 = vsub.f32 %v169_v11, %v5522_v30  ;;  %v6492_v7 = vand.u32 4294901760, %v5476_v36  ;;  %v5557_v4 = vand.u32 4294901760, %v170_v48  ;;  %6495 = vst [vmem:[#allocation38_spill] sm:$0xff] %v5561_v38  ;;  %v5573_v62 = vmul.f32 %v5297_v18, %v129_v45  ;;  %6497 = vst [vmem:[#allocation39_spill] sm:$0xff] %v5587_v50 }
  0x77   :  { %4350 = vmatpush3.bf16.msra.mxu1 %v5420_v24  ;;  %4446 = vmatpush3.bf16.msra.mxu0 %v5420_v24  ;;  %v121_v24 = vld [vmem:[#allocation7 + $0x30] sm:$0xff]  ;;  %v5559_v44 = vand.u32 4294901760, %v171_v43  ;;  %v6496_v29 = vand.u32 4294901760, %v5363_v51  ;;  %v429_v45 = vand.u32 4294901760, %v5542_v39  ;;  %v122_v39 = vld [vmem:[#allocation7 + $0x38] sm:$0xff]  ;;  %v6501_v2 = vand.u32 4294901760, %v5532_v60 }
  0x78   :  { %4352 = vmatprep.subr.bf16.mxu1 %v5434_v41  ;;  %4448 = vmatprep.subr.bf16.mxu0 %v5434_v41  ;;  %6491 = vst [vmem:[#allocation35_spill] sm:$0xff] %v5545_v21  ;;  %v5555_v32 = vsub.f32 %v5476_v36, %v6492_v7  ;;  %6493 = vst [vmem:[#allocation36_spill] sm:$0xff] %v5557_v4  ;;  %v5564_v11 = vmul.f32 %v5288_v16, %v121_v24  ;;  %v310_v19 = vand.u32 4294901760, %v5545_v21 }
  0x79   :  { %6494 = vst [vmem:[#allocation37_spill] sm:$0xff] %v5559_v44  ;;  %v164_v7 = vadd.f32 %v5548_v40, %v5537_v61  ;;  %v5580_v24 = vsub.f32 %v171_v43, %v5559_v44  ;;  %v5585_v6 = vsub.f32 %v5363_v51, %v6496_v29  ;;  %v5598_v51 = vpack.c.bf16 %v422_v15, %v415_v57  ;;  %v130_v15 = vld [vmem:[#allocation9 + $0x38] sm:$0xff] }
  0x7a   :  { %v311_v5 = vsub.f32 %v5545_v21, %v310_v19  ;;  %v165_v43 = vadd.f32 %v5573_v62, %v5564_v11  ;;  %v449_v44 = vsub.f32 %v5532_v60, %v6501_v2 }
  0x7b   :  { %4354 = vmatpush3.bf16.msra.mxu1 %v5434_v41  ;;  %4450 = vmatpush3.bf16.msra.mxu0 %v5434_v41  ;;  %v5577_v41 = vsub.f32 %v170_v48, %v5557_v4  ;;  %v172_v48 = vmul.f32 %v164_v7, %v5561_v38  ;;  %v6499_v38 = vand.u32 4294901760, %v5365_v52 }
  0x7c   :  { %4356 = vmatprep.subr.bf16.mxu1 %v5447_v12  ;;  %4452 = vmatprep.subr.bf16.mxu0 %v5443_v22  ;;  %v312_v7 = vand.u32 4294901760, %v311_v5  ;;  %v173_v57 = vmul.f32 %v165_v43, %v5587_v50  ;;  %v6502_v50 = vand.u32 4294901760, %v5371_v54 }
  0x7d   :  { %v320_v29 = vand.u32 4294901760, %v5577_v41 }
  0x7e   :  { %3564 = vmatmul.mubr.f32.vlgmr.msra.gmra.mrb[0].mxu1 %v302_v37  ;;  %3696 = vmatmul.mubr.f32.vlgmr.msra.gmra.mrb[0].mxu0 %v6498_v20  ;;  %v436_v37 = vand.u32 4294901760, %v5555_v32  ;;  %v330_v20 = vand.u32 4294901760, %v5580_v24  ;;  %v6500_v32 = vand.u32 4294901760, %v5527_v63  ;;  %v5625_v43 = vand.u32 4294901760, %v173_v57 }
  0x7f   :  { %4358 = vmatpush3.bf16.msra.mxu1 %v5447_v12  ;;  %4454 = vmatpush3.bf16.msra.mxu0 %v5443_v22  ;;  %v5608_v12 = vsub.f32 %v5365_v52, %v6499_v38  ;;  %v5610_v22 = vand.u32 4294901760, %v172_v48  ;;  %v321_v5 = vsub.f32 %v5577_v41, %v320_v29 }
  0x80   :  { %4360 = vmatprep.subr.bf16.mxu1 %v5489_v49  ;;  %4456 = vmatprep.subr.bf16.mxu0 %v5449_v1  ;;  %v442_v21 = vsub.f32 %v5527_v63, %v6500_v32  ;;  %v331_v4 = vsub.f32 %v5580_v24, %v330_v20  ;;  %v5628_v32 = vmul.f32 %v5288_v16, %v122_v39 }
  0x81   :  { %3698 = vmatprep.mubr.f32.mxu0 %v310_v19  ;;  %3566 = vmatprep.mubr.f32.mxu1 %v312_v7  ;;  %v5623_v38 = vsub.f32 %v172_v48, %v5610_v22  ;;  %v322_v2 = vand.u32 4294901760, %v321_v5  ;;  %v5638_v7 = vmul.f32 %v5297_v18, %v130_v15  ;;  %v462_v16 = vand.u32 4294901760, %v5608_v12 }
  0x82   :  { %3699 = vmatmul.mubr.f32.gmra.mrb[2].mxu0 %v320_v29  ;;  %v332_v19 = vand.u32 4294901760, %v331_v4  ;;  %v5635_v29 = vsub.f32 %v5371_v54, %v6502_v50  ;;  %v5645_v39 = vsub.f32 %v173_v57, %v5625_v43  ;;  %v6504_v4 = vand.u32 4294901760, %v5373_v55  ;;  %v5652_v54 = vld [vmem:[#allocation6 + $0x38] sm:$0xff] }
  0x83   :  { %4362 = vmatpush3.bf16.msra.mxu1 %v5489_v49  ;;  %4458 = vmatpush3.bf16.msra.mxu0 %v5449_v1  ;;  %v340_v48 = vand.u32 4294901760, %v5623_v38  ;;  %6505 = vst [vmem:[#allocation41_spill] sm:$0xff] %v5652_v54  ;;  %v184_v18 = vmul.f32 %v5323_v33, %v5323_v33  ;;  %v6506_v50 = vand.u32 4294901760, %v5463_v8  ;;  %v6507_v15 = vand.u32 4294901760, %v5476_v36 }
  0x84   :  { %4364 = vmatprep.subr.bf16.mxu1 %v5518_v9  ;;  %4460 = vmatprep.subr.bf16.mxu0 %v5485_v26  ;;  %6503 = vst [vmem:[#allocation40_spill] sm:$0xff] %v5645_v39  ;;  %v5650_v5 = vsub.f32 %v5373_v55, %v6504_v4  ;;  %v166_v57 = vadd.f32 %v5638_v7, %v5628_v32  ;;  %v443_v1 = vand.u32 4294901760, %v442_v21  ;;  %v450_v49 = vand.u32 4294901760, %v449_v44 }
  0x85   :  { %v5660_v52 = vpack.c.bf16 %v6507_v15, %v6506_v50  ;;  %3567 = vmatmul.mubr.f32.gmra.mrb[2].mxu1 %v322_v2  ;;  %3701 = vmatprep.mubr.f32.mxu0 %v330_v20  ;;  %v341_v55 = vsub.f32 %v5623_v38, %v340_v48  ;;  %v350_v4 = vand.u32 4294901760, %v5645_v39  ;;  %v5668_v33 = vpack.c.bf16 %v436_v37, %v429_v45 }
  0x86   :  { %3569 = vmatprep.mubr.f32.mxu1 %v332_v19  ;;  %3702 = vmatmul.mubr.f32.gmra.mrb[4].mxu0 %v340_v48  ;;  %v6509_v2 = vand.u32 4294901760, %v5585_v6  ;;  %v469_v50 = vand.u32 4294901760, %v5635_v29  ;;  %v174_v21 = vmul.f32 %v166_v57, %v5652_v54  ;;  %v463_v44 = vsub.f32 %v5608_v12, %v462_v16 }
  0x87   :  { %6508 = vst [vmem:[#allocation42_spill] sm:$0xff] %v5660_v52  ;;  %4366 = vmatpush3.bf16.msra.mxu1 %v5518_v9  ;;  %4462 = vmatpush3.bf16.msra.mxu0 %v5485_v26  ;;  %v342_v19 = vand.u32 4294901760, %v341_v55  ;;  %v351_v48 = vsub.f32 %v5645_v39, %v350_v4  ;;  %v476_v45 = vand.u32 4294901760, %v5650_v5  ;;  %v6510_v37 = vand.u32 4294901760, %v5527_v63 }
  0x88   :  { %v456_v20 = vsub.f32 %v5585_v6, %v6509_v2  ;;  %4368 = vmatprep.subr.bf16.mxu1 %v5598_v51  ;;  %4464 = vmatprep.subr.bf16.mxu0 %v5520_v17  ;;  %v6511_v15 = vand.u32 4294901760, %v5532_v60  ;;  %v5686_v26 = vand.u32 4294901760, %v174_v21  ;;  %v175_v57 = vmul.f32 %v5308_v25, %v5308_v25 }
  0x89   :  { %3704 = vmatprep.mubr.f32.mxu0 %v350_v4  ;;  %v5690_v9 = vpack.c.bf16 %v450_v49, %v443_v1  ;;  %3570 = vmatmul.mubr.f32.gmra.mrb[4].mxu1 %v342_v19  ;;  %v352_v55 = vand.u32 4294901760, %v351_v48  ;;  %v183_v54 = vmul.f32 %v5311_v27, %v5311_v27  ;;  %v5695_v39 = vadd.f32 %v184_v18, %v5438_v46 }
  0x8a   :  { %v5684_v2 = vpack.c.bf16 %v6511_v15, %v6510_v37  ;;  %v457_v4 = vand.u32 4294901760, %v456_v20  ;;  %v470_v37 = vsub.f32 %v5635_v29, %v469_v50  ;;  %v5701_v15 = vsub.f32 %v174_v21, %v5686_v26 }
  0x8b   :  { %4370 = vmatpush3.bf16.msra.mxu1 %v5598_v51  ;;  %4466 = vmatpush3.bf16.msra.mxu0 %v5520_v17  ;;  %v177_v25 = vmul.f32 %v5452_v0, %v5452_v0  ;;  %v464_v27 = vand.u32 4294901760, %v463_v44  ;;  %v477_v49 = vsub.f32 %v5650_v5, %v476_v45  ;;  %v5708_v1 = vadd.f32 %v183_v54, %v175_v57 }
  0x8c   :  { %6512 = vst [vmem:[#allocation43_spill] sm:$0xff] %v5684_v2  ;;  %4372 = vmatprep.subr.bf16.mxu1 %v5668_v33  ;;  %4468 = vmatprep.subr.bf16.mxu0 %v5660_v52  ;;  %v185_v46 = vmul.f32 %v5466_v14, %v5466_v14  ;;  %v360_v18 = vand.u32 4294901760, %v5701_v15  ;;  %v178_v20 = vmul.f32 %v5481_v34, %v5481_v34  ;;  %v6513_v44 = vand.u32 4294901760, %v5585_v6 }
  0x8d   :  { %3572 = vmatprep.mubr.f32.mxu1 %v352_v55  ;;  %v186_v54 = vmul.f32 %v5492_v23, %v5492_v23  ;;  %v5724_v14 = vpack.c.bf16 %v464_v27, %v457_v4  ;;  %v471_v19 = vand.u32 4294901760, %v470_v37  ;;  %v478_v48 = vand.u32 4294901760, %v477_v49 }
  0x8e   :  { %v5715_v21 = vadd.f32 %v185_v46, %v177_v25  ;;  %v361_v0 = vsub.f32 %v5701_v15, %v360_v18  ;;  %v5728_v34 = vpack.c.bf16 %v462_v16, %v6513_v44  ;;  %3705 = vmatmul.mubr.f32.gmra.mrb[6].mxu0 %v360_v18  ;;  %v179_v23 = vmul.f32 %v5495_v35, %v5495_v35  ;;  %v6521_v46 = vld [vmem:[#allocation16_spill] sm:$0xff] }
  0x8f   :  { %4374 = vmatpush3.bf16.msra.mxu1 %v5668_v33  ;;  %4470 = vmatpush3.bf16.msra.mxu0 %v5660_v52  ;;  %v5730_v55 = vadd.f32 %v186_v54, %v178_v20  ;;  %v187_v4 = vmul.f32 %v5498_v3, %v5498_v3  ;;  %v5741_v16 = vpack.c.bf16 %v478_v48, %v471_v19  ;;  %v6522_v20 = vld [vmem:[#allocation17_spill] sm:$0xff]  ;;  %v5855_v19 = vand.u32 4294901760, %v5708_v1  ;;  %v6528_v48 = vld [vmem:[#allocation19_spill] sm:$0xff] }
  0x90   :  { %4376 = vmatprep.subr.bf16.mxu1 %v5690_v9  ;;  %4472 = vmatprep.subr.bf16.mxu0 %v5684_v2  ;;  %6514 = vst [vmem:[#allocation44_spill] sm:$0xff] %v5728_v34  ;;  %v362_v57 = vand.u32 4294901760, %v361_v0  ;;  %v5743_v37 = vpack.c.bf16 %v476_v45, %v469_v50  ;;  %v180_v35 = vmul.f32 %v5537_v61, %v5537_v61  ;;  %v6524_v0 = vld [vmem:[#allocation21_spill] sm:$0xff] }
  0x91   :  { %3739 = vmatprep.mubr.f32.mxu0 %v5367_v53  ;;  %v5745_v25 = vadd.f32 %v187_v4, %v179_v23  ;;  %v5756_v3 = vpack.c.bf16 %v5317_v31, %v5313_v28  ;;  %v188_v50 = vmul.f32 %v5548_v40, %v5548_v40  ;;  %v181_v45 = vmul.f32 %v5564_v11, %v5564_v11  ;;  %v6517_v11 = vld [vmem:[#allocation13_spill] sm:$0xff] }
  0x92   :  { %6515 = vst [vmem:[#allocation45_spill] sm:$0xff] %v5743_v37  ;;  %3573 = vmatmul.mubr.f32.gmra.mrb[6].mxu1 %v362_v57  ;;  %v189_v61 = vmul.f32 %v5573_v62, %v5573_v62  ;;  %v182_v49 = vmul.f32 %v5628_v32, %v5628_v32  ;;  %v5774_v28 = vpack.c.bf16 %v5351_v47, %v5345_v42  ;;  %v6516_v47 = vld [vmem:[#allocation36_spill] sm:$0xff]  ;;  %v6529_v57 = vld [vmem:[#allocation35_spill] sm:$0xff] }
  0x93   :  { %4378 = vmatpush3.bf16.msra.mxu1 %v5690_v9  ;;  %4474 = vmatpush3.bf16.msra.mxu0 %v5684_v2  ;;  %v5762_v27 = vadd.f32 %v188_v50, %v180_v35  ;;  %v190_v62 = vmul.f32 %v5638_v7, %v5638_v7  ;;  %v5790_v42 = vpack.c.bf16 %v5382_v59, %v5379_v58  ;;  %v6518_v32 = vld [vmem:[#allocation20_spill] sm:$0xff]  ;;  %v6519_v7 = vld [vmem:[#allocation23_spill] sm:$0xff]  ;;  %v6520_v59 = vld [vmem:[#allocation37_spill] sm:$0xff] }
  0x94   :  { %4380 = vmatprep.subr.bf16.mxu1 %v5724_v14  ;;  %4476 = vmatprep.subr.bf16.mxu0 %v5728_v34  ;;  %v5776_v31 = vadd.f32 %v189_v61, %v181_v45  ;;  %v5802_v58 = vpack.c.bf16 %v6519_v7, %v6518_v32  ;;  %v5814_v18 = vpack.c.bf16 %v5476_v36, %v5463_v8  ;;  %v6523_v36 = vld [vmem:[#allocation18_spill] sm:$0xff]  ;;  %v6532_v45 = vld [vmem:[#allocation40_spill] sm:$0xff]  ;;  %v5905_v61 = vand.u32 4294901760, %v5695_v39 }
  0x95   :  { %3607 = vmatprep.mubr.f32.mxu1 %v5367_v53  ;;  %v5784_v40 = vadd.f32 %v190_v62, %v182_v49  ;;  %v5826_v8 = vpack.c.bf16 %v5532_v60, %v5527_v63  ;;  %v5836_v54 = vpack.c.bf16 %v5608_v12, %v5585_v6  ;;  %v6525_v60 = vld [vmem:[#allocation22_spill] sm:$0xff]  ;;  %v6527_v6 = vld [vmem:[#allocation24_spill] sm:$0xff]  ;;  %v6533_v49 = vld [vmem:[#allocation31_spill] sm:$0xff] }
  0x96   :  { %v6526_v63 = vld [vmem:[#allocation14_spill] sm:$0xff]  ;;  %v5924_v32 = vsub.f32 %v5695_v39, %v5905_v61 }
  0x97   :  { %4382 = vmatpush3.bf16.msra.mxu1 %v5724_v14  ;;  %4478 = vmatpush3.bf16.msra.mxu0 %v5728_v34  ;;  %v199_v44 = vmul.f32 %v6526_v63, %v6526_v63  ;;  %v6535_v63 = vld [vmem:[#allocation38_spill] sm:$0xff] }
  0x98   :  { %4384 = vmatprep.subr.bf16.mxu1 %v5741_v16  ;;  %4480 = vmatprep.subr.bf16.mxu0 %v5743_v37 }
  0x99   :  { %v5852_v12 = vand.u32 4294901760, %v199_v44 }
  0x9b   :  { %4386 = vmatpush3.bf16.msra.mxu1 %v5741_v16  ;;  %4482 = vmatpush3.bf16.msra.mxu0 %v5743_v37 }
  0x9c   :  { %4388 = vmatprep.subr.bf16.mxu1 %v5756_v3  ;;  %4484 = vmatprep.subr.bf16.mxu0 %v5276_v10 }
  0x9e   :  { %3608 = vmatmul.mubr.f32.vlgmr.msra.gmra.mrb[0].mxu1 %v5375_v56  ;;  %3740 = vmatmul.mubr.f32.vlgmr.msra.gmra.mrb[0].mxu0 %v5375_v56 }
  0x9f   :  { %4390 = vmatpush3.bf16.msra.mxu1 %v5756_v3  ;;  %4486 = vmatpush3.bf16.msra.mxu0 %v5276_v10 }
  0xa0   :  { %4392 = vmatprep.subr.bf16.mxu1 %v5774_v28  ;;  %4488 = vmatprep.subr.bf16.mxu0 %v5280_v13 }
  0xa1   :  { %3610 = vmatprep.mubr.f32.mxu1 %v5522_v30  ;;  %3742 = vmatprep.mubr.f32.mxu0 %v5522_v30 }
  0xa2   :  { %3611 = vmatmul.mubr.f32.gmra.mrb[2].mxu1 %v6516_v47  ;;  %3743 = vmatmul.mubr.f32.gmra.mrb[2].mxu0 %v6516_v47 }
  0xa3   :  { %4394 = vmatpush3.bf16.msra.mxu1 %v5774_v28  ;;  %4490 = vmatpush3.bf16.msra.mxu0 %v5280_v13 }
  0xa4   :  { %4396 = vmatprep.subr.bf16.mxu1 %v5790_v42  ;;  %4492 = vmatprep.subr.bf16.mxu0 %v6517_v11 }
  0xa5   :  { %3613 = vmatprep.mubr.f32.mxu1 %v6520_v59  ;;  %3745 = vmatprep.mubr.f32.mxu0 %v6520_v59 }
  0xa6   :  { %3614 = vmatmul.mubr.f32.gmra.mrb[4].mxu1 %v5610_v22  ;;  %3746 = vmatmul.mubr.f32.gmra.mrb[4].mxu0 %v5610_v22 }
  0xa7   :  { %4398 = vmatpush3.bf16.msra.mxu1 %v5790_v42  ;;  %4494 = vmatpush3.bf16.msra.mxu0 %v6517_v11 }
  0xa8   :  { %4400 = vmatprep.subr.bf16.mxu1 %v5802_v58  ;;  %4496 = vmatprep.subr.bf16.mxu0 %v6521_v46 }
  0xa9   :  { %3616 = vmatprep.mubr.f32.mxu1 %v5625_v43  ;;  %3748 = vmatprep.mubr.f32.mxu0 %v5625_v43 }
  0xaa   :  { %3617 = vmatmul.mubr.f32.gmra.mrb[6].mxu1 %v5686_v26  ;;  %3749 = vmatmul.mubr.f32.gmra.mrb[6].mxu0 %v5686_v26 }
  0xab   :  { %4402 = vmatpush3.bf16.msra.mxu1 %v5802_v58  ;;  %4498 = vmatpush3.bf16.msra.mxu0 %v6521_v46 }
  0xac   :  { %4404 = vmatprep.subr.bf16.mxu1 %v5814_v18  ;;  %4500 = vmatprep.subr.bf16.mxu0 %v6522_v20 }
  0xad   :  { %3651 = vmatprep.mubr.f32.mxu1 %v6523_v36  ;;  %3783 = vmatprep.mubr.f32.mxu0 %v5367_v53  ;;  %v5844_v53 = vpack.c.bf16 %v5650_v5, %v5635_v29  ;;  %v5863_v29 = vsub.f32 %v5708_v1, %v5855_v19  ;;  %v5866_v5 = vsub.f32 %v199_v44, %v5852_v12 }
  0xae   :  { %v204_v44 = vmul.f32 %v6535_v63, %v6535_v63 }
  0xaf   :  { %4406 = vmatpush3.bf16.msra.mxu1 %v5814_v18  ;;  %4502 = vmatpush3.bf16.msra.mxu0 %v6522_v20  ;;  %v6444_v1 = vand.u32 4294901760, %v5863_v29  ;;  %v6442_v23 = vand.u32 4294901760, %v5866_v5 }
  0xb0   :  { %4408 = vmatprep.subr.bf16.mxu1 %v5826_v8  ;;  %4504 = vmatprep.subr.bf16.mxu0 %v6524_v0 }
  0xb3   :  { %4410 = vmatpush3.bf16.msra.mxu1 %v5826_v8  ;;  %4506 = vmatpush3.bf16.msra.mxu0 %v6524_v0 }
  0xb4   :  { %4412 = vmatprep.subr.bf16.mxu1 %v5836_v54  ;;  %4508 = vmatprep.subr.bf16.mxu0 %v6525_v60 }
  0xb7   :  { %4414 = vmatpush3.bf16.msra.mxu1 %v5836_v54  ;;  %4510 = vmatpush3.bf16.msra.mxu0 %v6525_v60 }
  0xb8   :  { %4416 = vmatprep.subr.bf16.mxu1 %v5844_v53  ;;  %4512 = vmatprep.subr.bf16.mxu0 %v6527_v6 }
  0xbb   :  { %4418 = vmatpush3.bf16.msra.mxu1 %v5844_v53  ;;  %4514 = vmatpush3.bf16.msra.mxu0 %v6527_v6 }
  0xbc   :  { %4516 = vmatprep.subr.bf16.mxu1 %v5276_v10  ;;  %4708 = vmatprep.subr.bf16.mxu0 %v5276_v10 }
  0xbe   :  { %3652 = vmatmul.mubr.f32.vlgmr.msra.gmra.mrb[0].mxu1 %v6528_v48  ;;  %3784 = vmatmul.mubr.f32.vlgmr.msra.gmra.mrb[0].mxu0 %v5375_v56  ;;  %v6530_v56 = vld [vmem:[#allocation15_spill] sm:$0xff] }
  0xbf   :  { %4518 = vmatpush3.bf16.msra.mxu1 %v5276_v10  ;;  %4710 = vmatpush3.bf16.msra.mxu0 %v5276_v10  ;;  %v200_v4 = vmul.f32 %v6530_v56, %v6530_v56 }
  0xc0   :  { %3654 = vmatprep.mubr.f32.mxu1 %v6529_v57  ;;  %3786 = vmatprep.mubr.f32.mxu0 %v5522_v30  ;;  %v1233_v30 = vsub.f32 %v5863_v29, %v6444_v1  ;;  %v6445_v57 = vand.u32 4294901760, %v5924_v32  ;;  %v5994_v1 = vand.u32 4294901760, %v5776_v31 }
  0xc1   :  { %4520 = vmatprep.subr.bf16.mxu1 %v5280_v13  ;;  %4712 = vmatprep.subr.bf16.mxu0 %v5280_v13  ;;  %v5896_v35 = vand.u32 4294901760, %v200_v4 }
  0xc2   :  { %3655 = vmatmul.mubr.f32.gmra.mrb[2].mxu1 %v5577_v41  ;;  %3787 = vmatmul.mubr.f32.gmra.mrb[2].mxu0 %v6516_v47  ;;  %v2175_v41 = vsub.f32 %v5866_v5, %v6442_v23 }
  0xc3   :  { %4522 = vmatpush3.bf16.msra.mxu1 %v5280_v13  ;;  %4714 = vmatpush3.bf16.msra.mxu0 %v5280_v13  ;;  %v5914_v47 = vsub.f32 %v200_v4, %v5896_v35 }
  0xc4   :  { %3657 = vmatprep.mubr.f32.mxu1 %v5580_v24  ;;  %3789 = vmatprep.mubr.f32.mxu0 %v6520_v59  ;;  %v6531_v24 = vld [vmem:[#allocation28_spill] sm:$0xff]  ;;  %v2176_v62 = vand.u32 4294901760, %v2175_v41  ;;  %v5959_v41 = vand.u32 4294901760, %v5745_v25 }
  0xc5   :  { %4524 = vmatprep.subr.bf16.mxu1 %v6517_v11  ;;  %4716 = vmatprep.subr.bf16.mxu0 %v6517_v11  ;;  %v201_v50 = vmul.f32 %v6531_v24, %v6531_v24  ;;  %v6534_v59 = vld [vmem:[#allocation32_spill] sm:$0xff]  ;;  %v6443_v39 = vand.u32 4294901760, %v5914_v47 }
  0xc6   :  { %3658 = vmatmul.mubr.f32.gmra.mrb[4].mxu1 %v5623_v38  ;;  %3790 = vmatmul.mubr.f32.gmra.mrb[4].mxu0 %v5610_v22  ;;  %v202_v38 = vmul.f32 %v6533_v49, %v6533_v49  ;;  %v1234_v22 = vand.u32 4294901760, %v1233_v30  ;;  %v203_v36 = vmul.f32 %v6534_v59, %v6534_v59  ;;  %v5966_v49 = vand.u32 4294901760, %v5762_v27 }
  0xc7   :  { %4526 = vmatpush3.bf16.msra.mxu1 %v6517_v11  ;;  %4718 = vmatpush3.bf16.msra.mxu0 %v6517_v11  ;;  %v1243_v59 = vsub.f32 %v5924_v32, %v6445_v57  ;;  %v5988_v23 = vsub.f32 %v5745_v25, %v5959_v41 }
  0xc8   :  { %3660 = vmatprep.mubr.f32.mxu1 %v6532_v45  ;;  %3792 = vmatprep.mubr.f32.mxu0 %v5625_v43  ;;  %v5918_v43 = vand.u32 4294901760, %v201_v50  ;;  %v5932_v7 = vand.u32 4294901760, %v202_v38  ;;  %v5961_v24 = vand.u32 4294901760, %v203_v36  ;;  %v6000_v57 = vsub.f32 %v5762_v27, %v5966_v49 }
  0xc9   :  { %4528 = vmatprep.subr.bf16.mxu1 %v6521_v46  ;;  %4720 = vmatprep.subr.bf16.mxu0 %v6521_v46  ;;  %v1244_v27 = vand.u32 4294901760, %v1243_v59 }
  0xca   :  { %3661 = vmatmul.mubr.f32.gmra.mrb[6].mxu1 %v5701_v15  ;;  %3793 = vmatmul.mubr.f32.gmra.mrb[6].mxu0 %v5686_v26  ;;  %v5927_v15 = vand.u32 4294901760, %v5715_v21  ;;  %v5930_v26 = vand.u32 4294901760, %v5730_v55  ;;  %v5942_v48 = vsub.f32 %v201_v50, %v5918_v43  ;;  %v5956_v30 = vsub.f32 %v202_v38, %v5932_v7  ;;  %v6537_v50 = vld [vmem:[#allocation39_spill] sm:$0xff] }
  0xcb   :  { %4530 = vmatpush3.bf16.msra.mxu1 %v6521_v46  ;;  %4722 = vmatpush3.bf16.msra.mxu0 %v6521_v46  ;;  %v205_v45 = vmul.f32 %v6537_v50, %v6537_v50  ;;  %v2185_v38 = vsub.f32 %v5914_v47, %v6443_v39  ;;  %v5991_v39 = vsub.f32 %v203_v36, %v5961_v24 }
  0xcc   :  { %4532 = vmatprep.subr.bf16.mxu1 %v6522_v20  ;;  %4724 = vmatprep.subr.bf16.mxu0 %v6522_v20  ;;  %v5949_v56 = vsub.f32 %v5715_v21, %v5927_v15  ;;  %v5953_v4 = vsub.f32 %v5730_v55, %v5930_v26  ;;  %6536 = vst [vmem:[#allocation36_spill] sm:$0xff] %v5956_v30  ;;  %v5968_v21 = vand.u32 4294901760, %v204_v44  ;;  %v6540_v63 = vand.u32 4294901760, %v5942_v48 }
  0xcd   :  { %3827 = vmatprep.mubr.f32.mxu1 %v1234_v22  ;;  %4091 = vmatprep.mubr.f32.mxu0 %v2176_v62  ;;  %v6538_v22 = vld [vmem:[#allocation41_spill] sm:$0xff]  ;;  %v5996_v62 = vand.u32 4294901760, %v205_v45  ;;  %v2186_v36 = vand.u32 4294901760, %v2185_v38  ;;  %v6543_v17 = vand.u32 4294901760, %v5956_v30  ;;  %v6546_v46 = vand.u32 4294901760, %v5991_v39 }
  0xce   :  { %v206_v55 = vmul.f32 %v6538_v22, %v6538_v22  ;;  %v6003_v50 = vsub.f32 %v204_v44, %v5968_v21  ;;  %v6006_v22 = vand.u32 4294901760, %v5784_v40  ;;  %v2195_v37 = vsub.f32 %v5942_v48, %v6540_v63 }
  0xcf   :  { %4534 = vmatpush3.bf16.msra.mxu1 %v6522_v20  ;;  %4726 = vmatpush3.bf16.msra.mxu0 %v6522_v20  ;;  %v6541_v44 = vand.u32 4294901760, %v5949_v56  ;;  %v6542_v2 = vand.u32 4294901760, %v5953_v4  ;;  %v2205_v38 = vsub.f32 %v5956_v30, %v6543_v17  ;;  %v6033_v59 = vsub.f32 %v205_v45, %v5996_v62 }
  0xd0   :  { %4536 = vmatprep.subr.bf16.mxu1 %v6524_v0  ;;  %4728 = vmatprep.subr.bf16.mxu0 %v6524_v0  ;;  %6539 = vst [vmem:[#allocation20_spill] sm:$0xff] %v6003_v50  ;;  %v6008_v25 = vand.u32 4294901760, %v206_v55  ;;  %v2196_v63 = vand.u32 4294901760, %v2195_v37  ;;  %v6545_v20 = vand.u32 4294901760, %v5988_v23  ;;  %v6547_v30 = vand.u32 4294901760, %v6000_v57 }
  0xd1   :  { %v1253_v34 = vsub.f32 %v5949_v56, %v6541_v44  ;;  %v1263_v52 = vsub.f32 %v5953_v4, %v6542_v2  ;;  %v6039_v2 = vsub.f32 %v5784_v40, %v6006_v22 }
  0xd2   :  { %v6042_v17 = vsub.f32 %v206_v55, %v6008_v25  ;;  %v1273_v40 = vsub.f32 %v5988_v23, %v6545_v20  ;;  %v2215_v55 = vsub.f32 %v5991_v39, %v6546_v46  ;;  %v6549_v46 = vld [vmem:[#allocation30_spill] sm:$0xff] }
  0xd3   :  { %4538 = vmatpush3.bf16.msra.mxu1 %v6524_v0  ;;  %4730 = vmatpush3.bf16.msra.mxu0 %v6524_v0  ;;  %v6030_v0 = vsub.f32 %v5776_v31, %v5994_v1  ;;  %v6544_v31 = vld [vmem:[#allocation26_spill] sm:$0xff]  ;;  %v1254_v45 = vand.u32 4294901760, %v1253_v34  ;;  %v1264_v44 = vand.u32 4294901760, %v1263_v52  ;;  %v1283_v34 = vsub.f32 %v6000_v57, %v6547_v30 }
  0xd4   :  { %4540 = vmatprep.subr.bf16.mxu1 %v6525_v60  ;;  %4732 = vmatprep.subr.bf16.mxu0 %v6525_v60  ;;  %v6548_v52 = vand.u32 4294901760, %v6003_v50  ;;  %v1302_v20 = vand.u32 4294901760, %v6039_v2  ;;  %v2216_v30 = vand.u32 4294901760, %v2215_v55 }
  0xd5   :  { %v1292_v11 = vand.u32 4294901760, %v6030_v0 }
  0xd6   :  { %v2225_v37 = vsub.f32 %v6003_v50, %v6548_v52  ;;  %v1303_v50 = vsub.f32 %v6039_v2, %v1302_v20 }
  0xd7   :  { %4542 = vmatpush3.bf16.msra.mxu1 %v6525_v60  ;;  %4734 = vmatpush3.bf16.msra.mxu0 %v6525_v60  ;;  %v2206_v60 = vand.u32 4294901760, %v2205_v38  ;;  %v1284_v38 = vand.u32 4294901760, %v1283_v34 }
  0xd8   :  { %4544 = vmatprep.subr.bf16.mxu1 %v6527_v6  ;;  %4736 = vmatprep.subr.bf16.mxu0 %v6527_v6  ;;  %v1304_v55 = vand.u32 4294901760, %v1303_v50  ;;  %v6567_v50 = vand.u32 4294901760, %v5942_v48 }
  0xdb   :  { %4546 = vmatpush3.bf16.msra.mxu1 %v6527_v6  ;;  %4738 = vmatpush3.bf16.msra.mxu0 %v6527_v6  ;;  %v2234_v6 = vand.u32 4294901760, %v6033_v59 }
  0xdc   :  { %4548 = vmatprep.subr.bf16.mxu1 %v6544_v31  ;;  %4740 = vmatprep.subr.bf16.mxu0 %v6544_v31 }
  0xdd   :  { %v2235_v52 = vsub.f32 %v6033_v59, %v2234_v6 }
  0xde   :  { %3828 = vmatmul.mubr.f32.vlgmr.msra.gmra.mrb[8].mxu1 %v1244_v27  ;;  %4092 = vmatmul.mubr.f32.vlgmr.msra.gmra.mrb[8].mxu0 %v2186_v36  ;;  %v1274_v36 = vand.u32 4294901760, %v1273_v40  ;;  %v1293_v27 = vsub.f32 %v6030_v0, %v1292_v11  ;;  %v6551_v40 = vld [vmem:[#allocation33_spill] sm:$0xff] }
  0xdf   :  { %4550 = vmatpush3.bf16.msra.mxu1 %v6544_v31  ;;  %4742 = vmatpush3.bf16.msra.mxu0 %v6544_v31  ;;  %v2226_v31 = vand.u32 4294901760, %v2225_v37  ;;  %v6570_v37 = vld [vmem:[#allocation29_spill] sm:$0xff] }
  0xe0   :  { %4552 = vmatprep.subr.bf16.mxu1 %v6549_v46  ;;  %4744 = vmatprep.subr.bf16.mxu0 %v6549_v46 }
  0xe1   :  { %3830 = vmatprep.mubr.f32.mxu1 %v1254_v45  ;;  %4094 = vmatprep.mubr.f32.mxu0 %v2196_v63  ;;  %v6550_v63 = vand.u32 4294901760, %v6042_v17 }
  0xe2   :  { %3831 = vmatmul.mubr.f32.gmra.mrb[10].mxu1 %v1264_v44  ;;  %4095 = vmatmul.mubr.f32.gmra.mrb[10].mxu0 %v2206_v60  ;;  %v1294_v60 = vand.u32 4294901760, %v1293_v27  ;;  %v2236_v44 = vand.u32 4294901760, %v2235_v52 }
  0xe3   :  { %v2245_v45 = vsub.f32 %v6042_v17, %v6550_v63  ;;  %4554 = vmatpush3.bf16.msra.mxu1 %v6549_v46  ;;  %4746 = vmatpush3.bf16.msra.mxu0 %v6549_v46  ;;  %v6575_v46 = vld [vmem:[#allocation34_spill] sm:$0xff] }
  0xe4   :  { %4556 = vmatprep.subr.bf16.mxu1 %v6551_v40  ;;  %4748 = vmatprep.subr.bf16.mxu0 %v6551_v40 }
  0xe5   :  { %3833 = vmatprep.mubr.f32.mxu1 %v1274_v36  ;;  %4097 = vmatprep.mubr.f32.mxu0 %v2216_v30  ;;  %v2246_v34 = vand.u32 4294901760, %v2245_v45 }
  0xe6   :  { %3834 = vmatmul.mubr.f32.gmra.mrb[12].mxu1 %v1284_v38  ;;  %4098 = vmatmul.mubr.f32.gmra.mrb[12].mxu0 %v2226_v31 }
  0xe7   :  { %4558 = vmatpush3.bf16.msra.mxu1 %v6551_v40  ;;  %4750 = vmatpush3.bf16.msra.mxu0 %v6551_v40 }
  0xe8   :  { %4560 = vmatprep.subr.bf16.mxu1 %v5598_v51  ;;  %4752 = vmatprep.subr.bf16.mxu0 %v5598_v51 }
  0xe9   :  { %3836 = vmatprep.mubr.f32.mxu1 %v1294_v60  ;;  %4100 = vmatprep.mubr.f32.mxu0 %v2236_v44 }
  0xea   :  { %3837 = vmatmul.mubr.f32.gmra.mrb[14].mxu1 %v1304_v55  ;;  %4101 = vmatmul.mubr.f32.gmra.mrb[14].mxu0 %v2246_v34 }
  0xeb   :  { %4562 = vmatpush3.bf16.msra.mxu1 %v5598_v51  ;;  %4754 = vmatpush3.bf16.msra.mxu0 %v5598_v51  ;;  %v6553_v51 = vld [vmem:[#allocation13_spill] sm:$0xff] }
  0xec   :  { %4564 = vmatprep.subr.bf16.mxu1 %v5668_v33  ;;  %4756 = vmatprep.subr.bf16.mxu0 %v5668_v33 }
  0xed   :  { %3871 = vmatprep.mubr.f32.mxu1 %v5855_v19  ;;  %4135 = vmatprep.mubr.f32.mxu0 %v5852_v12 }
  0xef   :  { %4566 = vmatpush3.bf16.msra.mxu1 %v5668_v33  ;;  %4758 = vmatpush3.bf16.msra.mxu0 %v5668_v33  ;;  %v6554_v33 = vld [vmem:[#allocation20_spill] sm:$0xff] }
  0xf0   :  { %4568 = vmatprep.subr.bf16.mxu1 %v5690_v9  ;;  %4760 = vmatprep.subr.bf16.mxu0 %v5690_v9  ;;  %v6574_v38 = vand.u32 4294901760, %v6554_v33 }
  0xf3   :  { %4570 = vmatpush3.bf16.msra.mxu1 %v5690_v9  ;;  %4762 = vmatpush3.bf16.msra.mxu0 %v5690_v9  ;;  %v6552_v9 = vld [vmem:[#allocation36_spill] sm:$0xff] }
  0xf4   :  { %4572 = vmatprep.subr.bf16.mxu1 %v5724_v14  ;;  %4764 = vmatprep.subr.bf16.mxu0 %v5724_v14 }
  0xf7   :  { %4574 = vmatpush3.bf16.msra.mxu1 %v5724_v14  ;;  %4766 = vmatpush3.bf16.msra.mxu0 %v5724_v14  ;;  %v6555_v14 = vld [vmem:[#allocation16_spill] sm:$0xff] }
  0xf8   :  { %4576 = vmatprep.subr.bf16.mxu1 %v5741_v16  ;;  %4768 = vmatprep.subr.bf16.mxu0 %v5741_v16 }
  0xfb   :  { %4578 = vmatpush3.bf16.msra.mxu1 %v5741_v16  ;;  %4770 = vmatpush3.bf16.msra.mxu0 %v5741_v16  ;;  %v6556_v16 = vld [vmem:[#allocation17_spill] sm:$0xff] }
  0xfc   :  { %4580 = vmatprep.subr.bf16.mxu1 %v5756_v3  ;;  %4772 = vmatprep.subr.bf16.mxu0 %v5756_v3 }
  0xfe   :  { %3872 = vmatmul.mubr.f32.vlgmr.msra.gmra.mrb[8].mxu1 %v5905_v61  ;;  %4136 = vmatmul.mubr.f32.vlgmr.msra.gmra.mrb[8].mxu0 %v5896_v35 }
  0xff   :  { %4582 = vmatpush3.bf16.msra.mxu1 %v5756_v3  ;;  %4774 = vmatpush3.bf16.msra.mxu0 %v5756_v3  ;;  %v6557_v3 = vand.u32 4294901760, %v5863_v29 }
 0x100   :  { %4584 = vmatprep.subr.bf16.mxu1 %v5774_v28  ;;  %4776 = vmatprep.subr.bf16.mxu0 %v5774_v28 }
 0x101   :  { %3874 = vmatprep.mubr.f32.mxu1 %v5927_v15  ;;  %4138 = vmatprep.mubr.f32.mxu0 %v5918_v43 }
 0x102   :  { %3875 = vmatmul.mubr.f32.gmra.mrb[10].mxu1 %v5930_v26  ;;  %4139 = vmatmul.mubr.f32.gmra.mrb[10].mxu0 %v5932_v7 }
 0x103   :  { %4586 = vmatpush3.bf16.msra.mxu1 %v5774_v28  ;;  %4778 = vmatpush3.bf16.msra.mxu0 %v5774_v28  ;;  %v6558_v28 = vand.u32 4294901760, %v5866_v5 }
 0x104   :  { %4588 = vmatprep.subr.bf16.mxu1 %v5790_v42  ;;  %4780 = vmatprep.subr.bf16.mxu0 %v5790_v42 }
 0x105   :  { %3877 = vmatprep.mubr.f32.mxu1 %v5959_v41  ;;  %4141 = vmatprep.mubr.f32.mxu0 %v5961_v24 }
 0x106   :  { %3878 = vmatmul.mubr.f32.gmra.mrb[12].mxu1 %v5966_v49  ;;  %4142 = vmatmul.mubr.f32.gmra.mrb[12].mxu0 %v5968_v21 }
 0x107   :  { %4590 = vmatpush3.bf16.msra.mxu1 %v5790_v42  ;;  %4782 = vmatpush3.bf16.msra.mxu0 %v5790_v42  ;;  %v6559_v42 = vld [vmem:[#allocation21_spill] sm:$0xff] }
 0x108   :  { %4592 = vmatprep.subr.bf16.mxu1 %v5802_v58  ;;  %4784 = vmatprep.subr.bf16.mxu0 %v5802_v58 }
 0x109   :  { %3880 = vmatprep.mubr.f32.mxu1 %v5994_v1  ;;  %4144 = vmatprep.mubr.f32.mxu0 %v5996_v62 }
 0x10a   :  { %3881 = vmatmul.mubr.f32.gmra.mrb[14].mxu1 %v6006_v22  ;;  %4145 = vmatmul.mubr.f32.gmra.mrb[14].mxu0 %v6008_v25 }
 0x10b   :  { %4594 = vmatpush3.bf16.msra.mxu1 %v5802_v58  ;;  %4786 = vmatpush3.bf16.msra.mxu0 %v5802_v58  ;;  %v6560_v58 = vld [vmem:[#allocation22_spill] sm:$0xff] }
 0x10c   :  { %4596 = vmatprep.subr.bf16.mxu1 %v5814_v18  ;;  %4788 = vmatprep.subr.bf16.mxu0 %v5814_v18 }
 0x10d   :  { %3915 = vmatprep.mubr.f32.mxu1 %v5863_v29  ;;  %4179 = vmatprep.mubr.f32.mxu0 %v5866_v5  ;;  %v6565_v29 = vld [vmem:[#allocation27_spill] sm:$0xff]  ;;  %v6566_v5 = vand.u32 4294901760, %v5949_v56 }
 0x10f   :  { %4598 = vmatpush3.bf16.msra.mxu1 %v5814_v18  ;;  %4790 = vmatpush3.bf16.msra.mxu0 %v5814_v18  ;;  %v6561_v18 = vld [vmem:[#allocation24_spill] sm:$0xff] }
 0x110   :  { %4600 = vmatprep.subr.bf16.mxu1 %v5826_v8  ;;  %4792 = vmatprep.subr.bf16.mxu0 %v5826_v8 }
 0x113   :  { %4602 = vmatpush3.bf16.msra.mxu1 %v5826_v8  ;;  %4794 = vmatpush3.bf16.msra.mxu0 %v5826_v8  ;;  %v6562_v8 = vld [vmem:[#allocation25_spill] sm:$0xff] }
 0x114   :  { %4604 = vmatprep.subr.bf16.mxu1 %v5836_v54  ;;  %4796 = vmatprep.subr.bf16.mxu0 %v5836_v54 }
 0x117   :  { %4606 = vmatpush3.bf16.msra.mxu1 %v5836_v54  ;;  %4798 = vmatpush3.bf16.msra.mxu0 %v5836_v54  ;;  %v6563_v54 = vand.u32 4294901760, %v5924_v32 }
 0x118   :  { %4608 = vmatprep.subr.bf16.mxu1 %v5844_v53  ;;  %4800 = vmatprep.subr.bf16.mxu0 %v5844_v53 }
 0x11b   :  { %4610 = vmatpush3.bf16.msra.mxu1 %v5844_v53  ;;  %4802 = vmatpush3.bf16.msra.mxu0 %v5844_v53  ;;  %v6564_v53 = vand.u32 4294901760, %v5914_v47 }
 0x11c   :  { %4612 = vmatprep.subr.bf16.mxu1 %v5276_v10  ;;  %4804 = vmatprep.subr.bf16.mxu0 %v5276_v10 }
 0x11e   :  { %3916 = vmatmul.mubr.f32.vlgmr.msra.gmra.mrb[8].mxu1 %v5924_v32  ;;  %4180 = vmatmul.mubr.f32.vlgmr.msra.gmra.mrb[8].mxu0 %v5914_v47  ;;  %v6568_v32 = vand.u32 4294901760, %v5953_v4  ;;  %v6569_v47 = vand.u32 4294901760, %v6552_v9 }
 0x11f   :  { %4614 = vmatpush3.bf16.msra.mxu1 %v5276_v10  ;;  %4806 = vmatpush3.bf16.msra.mxu0 %v5276_v10 }
 0x120   :  { %4616 = vmatprep.subr.bf16.mxu1 %v5280_v13  ;;  %4808 = vmatprep.subr.bf16.mxu0 %v5280_v13 }
 0x121   :  { %3918 = vmatprep.mubr.f32.mxu1 %v5949_v56  ;;  %4182 = vmatprep.mubr.f32.mxu0 %v5942_v48  ;;  %v6571_v56 = vand.u32 4294901760, %v5988_v23  ;;  %v6572_v48 = vand.u32 4294901760, %v5991_v39 }
 0x122   :  { %3919 = vmatmul.mubr.f32.gmra.mrb[10].mxu1 %v5953_v4  ;;  %4183 = vmatmul.mubr.f32.gmra.mrb[10].mxu0 %v6552_v9  ;;  %v6573_v4 = vand.u32 4294901760, %v6000_v57 }
 0x123   :  { %4618 = vmatpush3.bf16.msra.mxu1 %v5280_v13  ;;  %4810 = vmatpush3.bf16.msra.mxu0 %v5280_v13 }
 0x124   :  { %4620 = vmatprep.subr.bf16.mxu1 %v6553_v51  ;;  %4812 = vmatprep.subr.bf16.mxu0 %v6553_v51 }
 0x125   :  { %3921 = vmatprep.mubr.f32.mxu1 %v5988_v23  ;;  %4185 = vmatprep.mubr.f32.mxu0 %v5991_v39  ;;  %v6576_v23 = vmov %v6550_v63  ;;  %v6577_v39 = vld [vmem:[#allocation42_spill] sm:$0xff] }
 0x126   :  { %3922 = vmatmul.mubr.f32.gmra.mrb[12].mxu1 %v6000_v57  ;;  %4186 = vmatmul.mubr.f32.gmra.mrb[12].mxu0 %v6554_v33 }
 0x127   :  { %4622 = vmatpush3.bf16.msra.mxu1 %v6553_v51  ;;  %4814 = vmatpush3.bf16.msra.mxu0 %v6553_v51 }
 0x128   :  { %4624 = vmatprep.subr.bf16.mxu1 %v6555_v14  ;;  %4816 = vmatprep.subr.bf16.mxu0 %v6555_v14 }
 0x129   :  { %3924 = vmatprep.mubr.f32.mxu1 %v6030_v0  ;;  %4188 = vmatprep.mubr.f32.mxu0 %v6033_v59  ;;  %v6579_v0 = vld [vmem:[#allocation44_spill] sm:$0xff] }
 0x12a   :  { %3925 = vmatmul.mubr.f32.gmra.mrb[14].mxu1 %v6039_v2  ;;  %4189 = vmatmul.mubr.f32.gmra.mrb[14].mxu0 %v6042_v17 }
 0x12b   :  { %4626 = vmatpush3.bf16.msra.mxu1 %v6555_v14  ;;  %4818 = vmatpush3.bf16.msra.mxu0 %v6555_v14 }
 0x12c   :  { %4628 = vmatprep.subr.bf16.mxu1 %v6556_v16  ;;  %4820 = vmatprep.subr.bf16.mxu0 %v6556_v16 }
 0x12d   :  { %3959 = vmatprep.mubr.f32.mxu1 %v6557_v3  ;;  %4223 = vmatprep.mubr.f32.mxu0 %v6558_v28 }
 0x12f   :  { %4630 = vmatpush3.bf16.msra.mxu1 %v6556_v16  ;;  %4822 = vmatpush3.bf16.msra.mxu0 %v6556_v16 }
 0x130   :  { %4632 = vmatprep.subr.bf16.mxu1 %v6559_v42  ;;  %4824 = vmatprep.subr.bf16.mxu0 %v6559_v42 }
 0x133   :  { %4634 = vmatpush3.bf16.msra.mxu1 %v6559_v42  ;;  %4826 = vmatpush3.bf16.msra.mxu0 %v6559_v42 }
 0x134   :  { %4636 = vmatprep.subr.bf16.mxu1 %v6560_v58  ;;  %4828 = vmatprep.subr.bf16.mxu0 %v6560_v58 }
 0x137   :  { %4638 = vmatpush3.bf16.msra.mxu1 %v6560_v58  ;;  %4830 = vmatpush3.bf16.msra.mxu0 %v6560_v58 }
 0x138   :  { %4640 = vmatprep.subr.bf16.mxu1 %v6561_v18  ;;  %4832 = vmatprep.subr.bf16.mxu0 %v6561_v18 }
 0x13b   :  { %4642 = vmatpush3.bf16.msra.mxu1 %v6561_v18  ;;  %4834 = vmatpush3.bf16.msra.mxu0 %v6561_v18 }
 0x13c   :  { %4644 = vmatprep.subr.bf16.mxu1 %v6562_v8  ;;  %4836 = vmatprep.subr.bf16.mxu0 %v6562_v8 }
 0x13e   :  { %3960 = vmatmul.mubr.f32.vlgmr.msra.gmra.mrb[8].mxu1 %v6563_v54  ;;  %4224 = vmatmul.mubr.f32.vlgmr.msra.gmra.mrb[8].mxu0 %v6564_v53 }
 0x13f   :  { %4646 = vmatpush3.bf16.msra.mxu1 %v6562_v8  ;;  %4838 = vmatpush3.bf16.msra.mxu0 %v6562_v8 }
 0x140   :  { %4648 = vmatprep.subr.bf16.mxu1 %v6565_v29  ;;  %4840 = vmatprep.subr.bf16.mxu0 %v6565_v29 }
 0x141   :  { %3962 = vmatprep.mubr.f32.mxu1 %v6566_v5  ;;  %4226 = vmatprep.mubr.f32.mxu0 %v6567_v50 }
 0x142   :  { %3963 = vmatmul.mubr.f32.gmra.mrb[10].mxu1 %v6568_v32  ;;  %4227 = vmatmul.mubr.f32.gmra.mrb[10].mxu0 %v6569_v47 }
 0x143   :  { %4650 = vmatpush3.bf16.msra.mxu1 %v6565_v29  ;;  %4842 = vmatpush3.bf16.msra.mxu0 %v6565_v29 }
 0x144   :  { %4652 = vmatprep.subr.bf16.mxu1 %v6570_v37  ;;  %4844 = vmatprep.subr.bf16.mxu0 %v6570_v37 }
 0x145   :  { %3965 = vmatprep.mubr.f32.mxu1 %v6571_v56  ;;  %4229 = vmatprep.mubr.f32.mxu0 %v6572_v48 }
 0x146   :  { %3966 = vmatmul.mubr.f32.gmra.mrb[12].mxu1 %v6573_v4  ;;  %4230 = vmatmul.mubr.f32.gmra.mrb[12].mxu0 %v6574_v38 }
 0x147   :  { %4654 = vmatpush3.bf16.msra.mxu1 %v6570_v37  ;;  %4846 = vmatpush3.bf16.msra.mxu0 %v6570_v37 }
 0x148   :  { %4656 = vmatprep.subr.bf16.mxu1 %v6575_v46  ;;  %4848 = vmatprep.subr.bf16.mxu0 %v6575_v46 }
 0x149   :  { %3968 = vmatprep.mubr.f32.mxu1 %v1292_v11  ;;  %4232 = vmatprep.mubr.f32.mxu0 %v2234_v6  ;;  %v6578_v11 = vld [vmem:[#allocation43_spill] sm:$0xff]  ;;  %v6580_v6 = vld [vmem:[#allocation45_spill] sm:$0xff] }
 0x14a   :  { %3969 = vmatmul.mubr.f32.gmra.mrb[14].mxu1 %v1302_v20  ;;  %4233 = vmatmul.mubr.f32.gmra.mrb[14].mxu0 %v6576_v23 }
 0x14b   :  { %4658 = vmatpush3.bf16.msra.mxu1 %v6575_v46  ;;  %4850 = vmatpush3.bf16.msra.mxu0 %v6575_v46 }
 0x14c   :  { %4660 = vmatprep.subr.bf16.mxu1 %v6577_v39  ;;  %4852 = vmatprep.subr.bf16.mxu0 %v6577_v39 }
 0x14d   :  { %4003 = vmatprep.mubr.f32.mxu1 %v5855_v19  ;;  %4267 = vmatprep.mubr.f32.mxu0 %v5852_v12 }
 0x14f   :  { %4662 = vmatpush3.bf16.msra.mxu1 %v6577_v39  ;;  %4854 = vmatpush3.bf16.msra.mxu0 %v6577_v39 }
 0x150   :  { %4664 = vmatprep.subr.bf16.mxu1 %v6578_v11  ;;  %4856 = vmatprep.subr.bf16.mxu0 %v6578_v11 }
 0x153   :  { %4666 = vmatpush3.bf16.msra.mxu1 %v6578_v11  ;;  %4858 = vmatpush3.bf16.msra.mxu0 %v6578_v11 }
 0x154   :  { %4668 = vmatprep.subr.bf16.mxu1 %v6579_v0  ;;  %4860 = vmatprep.subr.bf16.mxu0 %v6579_v0 }
 0x157   :  { %4670 = vmatpush3.bf16.msra.mxu1 %v6579_v0  ;;  %4862 = vmatpush3.bf16.msra.mxu0 %v6579_v0 }
 0x158   :  { %4672 = vmatprep.subr.bf16.mxu1 %v6580_v6  ;;  %4864 = vmatprep.subr.bf16.mxu0 %v6580_v6 }
 0x15b   :  { %4674 = vmatpush3.bf16.msra.mxu1 %v6580_v6  ;;  %4866 = vmatpush3.bf16.msra.mxu0 %v6580_v6 }
 0x15c   :  { %4676 = vmatprep.subr.bf16.mxu1 %v5276_v10  ;;  %4868 = vmatprep.subr.bf16.mxu0 %v5276_v10 }
 0x15e   :  { %4004 = vmatmul.mubr.f32.vlgmr.msra.gmra.mrb[8].mxu1 %v5905_v61  ;;  %4268 = vmatmul.mubr.f32.vlgmr.msra.gmra.mrb[8].mxu0 %v5896_v35 }
 0x15f   :  { %4678 = vmatpush3.bf16.msra.mxu1 %v5276_v10  ;;  %4870 = vmatpush3.bf16.msra.mxu0 %v5276_v10 }
 0x160   :  { %4680 = vmatprep.subr.bf16.mxu1 %v5280_v13  ;;  %4872 = vmatprep.subr.bf16.mxu0 %v5280_v13 }
 0x161   :  { %4006 = vmatprep.mubr.f32.mxu1 %v5927_v15  ;;  %4270 = vmatprep.mubr.f32.mxu0 %v5918_v43 }
 0x162   :  { %4007 = vmatmul.mubr.f32.gmra.mrb[10].mxu1 %v5930_v26  ;;  %4271 = vmatmul.mubr.f32.gmra.mrb[10].mxu0 %v5932_v7 }
 0x163   :  { %4682 = vmatpush3.bf16.msra.mxu1 %v5280_v13  ;;  %4874 = vmatpush3.bf16.msra.mxu0 %v5280_v13 }
 0x164   :  { %4684 = vmatprep.subr.bf16.mxu1 %v6553_v51  ;;  %4876 = vmatprep.subr.bf16.mxu0 %v6553_v51 }
 0x165   :  { %4009 = vmatprep.mubr.f32.mxu1 %v5959_v41  ;;  %4273 = vmatprep.mubr.f32.mxu0 %v5961_v24 }
 0x166   :  { %4010 = vmatmul.mubr.f32.gmra.mrb[12].mxu1 %v5966_v49  ;;  %4274 = vmatmul.mubr.f32.gmra.mrb[12].mxu0 %v5968_v21 }
 0x167   :  { %4686 = vmatpush3.bf16.msra.mxu1 %v6553_v51  ;;  %4878 = vmatpush3.bf16.msra.mxu0 %v6553_v51 }
 0x168   :  { %4688 = vmatprep.subr.bf16.mxu1 %v6555_v14  ;;  %4880 = vmatprep.subr.bf16.mxu0 %v6555_v14 }
 0x169   :  { %4012 = vmatprep.mubr.f32.mxu1 %v5994_v1  ;;  %4276 = vmatprep.mubr.f32.mxu0 %v5996_v62 }
 0x16a   :  { %4013 = vmatmul.mubr.f32.gmra.mrb[14].mxu1 %v6006_v22  ;;  %4277 = vmatmul.mubr.f32.gmra.mrb[14].mxu0 %v6008_v25 }
 0x16b   :  { %4690 = vmatpush3.bf16.msra.mxu1 %v6555_v14  ;;  %4882 = vmatpush3.bf16.msra.mxu0 %v6555_v14 }
 0x16c   :  { %4692 = vmatprep.subr.bf16.mxu1 %v6556_v16  ;;  %4884 = vmatprep.subr.bf16.mxu0 %v6556_v16 }
 0x16d   :  { %4047 = vmatprep.mubr.f32.mxu1 %v5855_v19  ;;  %4311 = vmatprep.mubr.f32.mxu0 %v5852_v12 }
 0x16f   :  { %4694 = vmatpush3.bf16.msra.mxu1 %v6556_v16  ;;  %4886 = vmatpush3.bf16.msra.mxu0 %v6556_v16 }
 0x170   :  { %4696 = vmatprep.subr.bf16.mxu1 %v6559_v42  ;;  %4888 = vmatprep.subr.bf16.mxu0 %v6559_v42 }
 0x173   :  { %4698 = vmatpush3.bf16.msra.mxu1 %v6559_v42  ;;  %4890 = vmatpush3.bf16.msra.mxu0 %v6559_v42 }
 0x174   :  { %4700 = vmatprep.subr.bf16.mxu1 %v6560_v58  ;;  %4892 = vmatprep.subr.bf16.mxu0 %v6560_v58 }
 0x177   :  { %4702 = vmatpush3.bf16.msra.mxu1 %v6560_v58  ;;  %4894 = vmatpush3.bf16.msra.mxu0 %v6560_v58 }
 0x178   :  { %4704 = vmatprep.subr.bf16.mxu1 %v6561_v18  ;;  %4896 = vmatprep.subr.bf16.mxu0 %v6561_v18 }
 0x17b   :  { %4706 = vmatpush3.bf16.msra.mxu1 %v6561_v18  ;;  %4898 = vmatpush3.bf16.msra.mxu0 %v6561_v18 }
 0x17e   :  { %4048 = vmatmul.mubr.f32.vlgmr.msra.gmra.mrb[8].mxu1 %v5905_v61  ;;  %4312 = vmatmul.mubr.f32.vlgmr.msra.gmra.mrb[8].mxu0 %v5896_v35 }
 0x17f   :  { %4050 = vmatprep.mubr.f32.mxu1 %v5927_v15  ;;  %4314 = vmatprep.mubr.f32.mxu0 %v5918_v43 }
 0x182   :  { %4051 = vmatmul.mubr.f32.gmra.mrb[10].mxu1 %v5930_v26  ;;  %4315 = vmatmul.mubr.f32.gmra.mrb[10].mxu0 %v5932_v7 }
 0x183   :  { %4053 = vmatprep.mubr.f32.mxu1 %v5959_v41  ;;  %4317 = vmatprep.mubr.f32.mxu0 %v5961_v24 }
 0x186   :  { %4054 = vmatmul.mubr.f32.gmra.mrb[12].mxu1 %v5966_v49  ;;  %4318 = vmatmul.mubr.f32.gmra.mrb[12].mxu0 %v5968_v21 }
 0x187   :  { %4056 = vmatprep.mubr.f32.mxu1 %v5994_v1  ;;  %4320 = vmatprep.mubr.f32.mxu0 %v5996_v62 }
 0x18a   :  { %4057 = vmatmul.mubr.f32.gmra.mrb[14].mxu1 %v6006_v22  ;;  %4321 = vmatmul.mubr.f32.gmra.mrb[14].mxu0 %v6008_v25 }
 0x191   :  { %v3653_v10 = vpop.f32.mrb[0].mxu1  ;;  %v3785_v13 = vpop.f32.mrb[0].mxu0 }
 0x192   :  { %v6330_v12 = vadd.f32 %v3785_v13, %v3653_v10  ;;  %v661_v19 = vpop.f32.mrb[1].mxu1  ;;  %v1103_v35 = vpop.f32.mrb[1].mxu0 }
 0x193   :  { %v6332_v61 = vadd.f32 %v1103_v35, %v661_v19 }
 0x195   :  { %v3656_v43 = vpop.f32.mrb[2].mxu1  ;;  %v3788_v15 = vpop.f32.mrb[2].mxu0 }
 0x196   :  { %v6334_v26 = vadd.f32 %v3788_v15, %v3656_v43  ;;  %v675_v7 = vpop.f32.mrb[3].mxu1  ;;  %v1115_v1 = vpop.f32.mrb[3].mxu0 }
 0x197   :  { %v6336_v57 = vadd.f32 %v1115_v1, %v675_v7 }
 0x199   :  { %v3659_v41 = vpop.f32.mrb[4].mxu1  ;;  %v3791_v24 = vpop.f32.mrb[4].mxu0 }
 0x19a   :  { %v6338_v49 = vadd.f32 %v3791_v24, %v3659_v41  ;;  %v689_v21 = vpop.f32.mrb[5].mxu1  ;;  %v1127_v62 = vpop.f32.mrb[5].mxu0 }
 0x19b   :  { %v6340_v22 = vadd.f32 %v1127_v62, %v689_v21 }
 0x19d   :  { %v3662_v25 = vpop.f32.mrb[6].mxu1  ;;  %v3794_v59 = vpop.f32.mrb[6].mxu0 }
 0x19e   :  { %v6342_v2 = vadd.f32 %v3794_v59, %v3662_v25  ;;  %v703_v17 = vpop.f32.mrb[7].mxu1  ;;  %v1139_v20 = vpop.f32.mrb[7].mxu0 }
 0x19f   :  { %v6344_v36 = vadd.f32 %v1139_v20, %v703_v17 }
 0x251   :  { %v4049_v30 = vpop.f32.mrb[8].mxu1  ;;  %v4313_v27 = vpop.f32.mrb[8].mxu0 }
 0x252   :  { %v3034_v52 = vmul.f32 2.0, %v4313_v27  ;;  %v2045_v31 = vpop.f32.mrb[9].mxu1  ;;  %v2987_v63 = vpop.f32.mrb[9].mxu0  ;;  %v3042_v40 = vmax.f32 %v4049_v30, 1e-16 }
 0x253   :  { %v3033_v45 = vmul.f32 2.0, %v2987_v63  ;;  %v3041_v44 = vmax.f32 %v2045_v31, 1e-16 }
 0x254   :  { %v3050_v60 = vmax.f32 %v3034_v52, 1e-16 }
 0x255   :  { %v3049_v55 = vmax.f32 %v3033_v45, 1e-16  ;;  %v4052_v34 = vpop.f32.mrb[10].mxu1  ;;  %v4316_v9 = vpop.f32.mrb[10].mxu0 }
 0x256   :  { %v3058_v51 = vmul.f32 %v3050_v60, %v3042_v40  ;;  %v3036_v33 = vmul.f32 2.0, %v4316_v9  ;;  %v2057_v14 = vpop.f32.mrb[11].mxu1  ;;  %v2999_v16 = vpop.f32.mrb[11].mxu0  ;;  %v3044_v42 = vmax.f32 %v4052_v34, 1e-16 }
 0x257   :  { %v3057_v3 = vmul.f32 %v3049_v55, %v3041_v44  ;;  %v3035_v28 = vmul.f32 2.0, %v2999_v16  ;;  %v3043_v18 = vmax.f32 %v2057_v14, 1e-16 }
 0x258   :  { %5026 = vrsqrt.f32 %v3058_v51  ;;  %v3052_v58 = vmax.f32 %v3036_v33, 1e-16 }
 0x259   :  { %5028 = vrsqrt.f32 %v3057_v3  ;;  %v3051_v8 = vmax.f32 %v3035_v28, 1e-16  ;;  %v4055_v54 = vpop.f32.mrb[12].mxu1  ;;  %v4319_v53 = vpop.f32.mrb[12].mxu0 }
 0x25a   :  { %v3060_v29 = vmul.f32 %v3052_v58, %v3044_v42  ;;  %v3038_v5 = vmul.f32 2.0, %v4319_v53  ;;  %v2069_v50 = vpop.f32.mrb[13].mxu1  ;;  %v3011_v32 = vpop.f32.mrb[13].mxu0  ;;  %v3046_v56 = vmax.f32 %v4055_v54, 1e-16 }
 0x25b   :  { %v3059_v47 = vmul.f32 %v3051_v8, %v3043_v18  ;;  %v3037_v37 = vmul.f32 2.0, %v3011_v32  ;;  %v3045_v4 = vmax.f32 %v2069_v50, 1e-16 }
 0x25c   :  { %5030 = vrsqrt.f32 %v3060_v29  ;;  %v3054_v48 = vmax.f32 %v3038_v5, 1e-16 }
 0x25d   :  { %5032 = vrsqrt.f32 %v3059_v47  ;;  %v3053_v38 = vmax.f32 %v3037_v37, 1e-16  ;;  %v4058_v46 = vpop.f32.mrb[14].mxu1  ;;  %v4322_v23 = vpop.f32.mrb[14].mxu0 }
 0x25e   :  { %v3062_v39 = vmul.f32 %v3054_v48, %v3046_v56  ;;  %v3040_v11 = vmul.f32 2.0, %v4322_v23  ;;  %v2081_v0 = vpop.f32.mrb[15].mxu1  ;;  %v3023_v6 = vpop.f32.mrb[15].mxu0  ;;  %v3048_v19 = vmax.f32 %v4058_v46, 1e-16 }
 0x25f   :  { %v3061_v10 = vmul.f32 %v3053_v38, %v3045_v4  ;;  %v3039_v13 = vmul.f32 2.0, %v3023_v6  ;;  %v3047_v43 = vmax.f32 %v2081_v0, 1e-16 }
 0x260   :  { %5034 = vrsqrt.f32 %v3062_v39  ;;  %v3056_v35 = vmax.f32 %v3040_v11, 1e-16 }
 0x261   :  { %5036 = vrsqrt.f32 %v3061_v10  ;;  %v3055_v15 = vmax.f32 %v3039_v13, 1e-16 }
 0x262   :  { %v5027_v7 = vpop.eup %5026  ;;  %v3064_v1 = vmul.f32 %v3056_v35, %v3048_v19 }
 0x263   :  { %v5029_v41 = vpop.eup %5028  ;;  %v3074_v24 = vmul.f32 %v5027_v7, %v6330_v12  ;;  %v3063_v21 = vmul.f32 %v3055_v15, %v3047_v43 }
 0x264   :  { %v3073_v62 = vmul.f32 %v5029_v41, %v6332_v61  ;;  %5038 = vrsqrt.f32 %v3064_v1 }
 0x265   :  { %3083 = vst.msk [vmem:[%s6392_s6 + $0x8] sm:$0xff] %vm3081_vm0, %v3074_v24  ;;  %5040 = vrsqrt.f32 %v3063_v21 }
 0x266   :  { %v5031_v25 = vpop.eup %5030  ;;  %3082 = vst.msk [vmem:[%s6392_s6] sm:$0xff] %vm3081_vm0, %v3073_v62 }
 0x267   :  { %v5033_v59 = vpop.eup %5032  ;;  %v3076_v17 = vmul.f32 %v5031_v25, %v6334_v26 }
 0x268   :  { %v3075_v12 = vmul.f32 %v5033_v59, %v6336_v57 }
 0x269   :  { %3085 = vst.msk [vmem:[%s6392_s6 + $0x18] sm:$0xff] %vm3081_vm0, %v3076_v17 }
 0x26a   :  { %v5035_v61 = vpop.eup %5034  ;;  %3084 = vst.msk [vmem:[%s6392_s6 + $0x10] sm:$0xff] %vm3081_vm0, %v3075_v12 }
 0x26b   :  { %v5037_v20 = vpop.eup %5036  ;;  %v3078_v30 = vmul.f32 %v5035_v61, %v6338_v49 }
 0x26c   :  { %v3077_v27 = vmul.f32 %v5037_v20, %v6340_v22 }
 0x26d   :  { %3087 = vst.msk [vmem:[%s6392_s6 + $0x28] sm:$0xff] %vm3081_vm0, %v3078_v30 }
 0x26e   :  { %v5039_v26 = vpop.eup %5038  ;;  %3086 = vst.msk [vmem:[%s6392_s6 + $0x20] sm:$0xff] %vm3081_vm0, %v3077_v27 }
 0x26f   :  { %v5041_v57 = vpop.eup %5040  ;;  %v3080_v52 = vmul.f32 %v5039_v26, %v6342_v2 }
 0x270   :  { %v3079_v31 = vmul.f32 %v5041_v57, %v6344_v36 }
 0x271   :  { %3089 = vst.msk [vmem:[%s6392_s6 + $0x38] sm:$0xff] %vm3081_vm0, %v3080_v52 }
 0x272   :  { %3088 = vst.msk [vmem:[%s6392_s6 + $0x30] sm:$0xff] %vm3081_vm0, %v3079_v31 }
 0x273   :  { %3094 = vsyncpa [#allocation3], 1 }
 0x274   :  { %3095 = vsyncpa [#allocation5], 1 }
 0x275   :  { %3096 = vsyncpa [#allocation8], 1 }

</bundles_post_ra>
